<compile_context>
chip_gen: v7x
topology: tpu7x:2x2x1
jax: 0.10.0
libtpu: 0.0.40
codegen_flags: <defaults>
</compile_context>

<pallas_src>
import functools

import jax
import jax.numpy as jnp
from jax.experimental import pallas as pl
from jax.experimental.pallas import tpu as pltpu


def _round_up(n, m):
    return -(-n // m) * m


def actor_critic_kernel(x_ref,
                        w1_ref, b1_ref,
                        w2_ref, b2_ref,
                        w3_ref, b3_ref,
                        wh_ref, bh_ref,
                        out_ref, *, action_dim):
    # x: (TB, K_pad) f32 (state zero-padded to 128 on the contraction axis).
    x = x_ref[...]

    # Linear(state_dim,512) + ReLU   (bf16 MXU inputs, f32 accumulate)
    h1 = jnp.dot(x.astype(jnp.bfloat16), w1_ref[...],
                 preferred_element_type=jnp.float32) + b1_ref[...]
    h1 = jnp.maximum(h1, 0.0)

    # Linear(512,256) + ReLU
    h2 = jnp.dot(h1.astype(jnp.bfloat16), w2_ref[...],
                 preferred_element_type=jnp.float32) + b2_ref[...]
    h2 = jnp.maximum(h2, 0.0)

    # Linear(256,128), then the extra F.relu in forward()
    h3 = jnp.dot(h2.astype(jnp.bfloat16), w3_ref[...],
                 preferred_element_type=jnp.float32) + b3_ref[...]
    feat = jnp.maximum(h3, 0.0)

    # Fused heads: cols [0, A) are action logits, col A is the state value,
    # cols > A are zero padding (zero weights / zero bias).
    head = jnp.dot(feat.astype(jnp.bfloat16), wh_ref[...],
                   preferred_element_type=jnp.float32) + bh_ref[...]

    col = jax.lax.broadcasted_iota(jnp.int32, head.shape, 1)
    is_action = col < action_dim

    # log-softmax over the real action columns only.
    masked = jnp.where(is_action, head, -1e30)
    m = jnp.max(masked, axis=-1, keepdims=True)
    shifted = masked - m
    denom = jnp.sum(jnp.exp(shifted), axis=-1, keepdims=True)
    logp = shifted - jnp.log(denom)

    # Single lane-dense (TB, 128) output: log-probs in [0,A), value at col A.
    out_ref[...] = jnp.where(is_action, logp, head)


def prepare_params(params, state_dim, action_dim):
    """Pad / fuse / downcast the f32 (in,out)-layout params once."""
    w1, b1, w2, b2, w3, b3, wa, ba, wv, bv = params
    sd_pad = _round_up(max(state_dim, 1), 128)

    w1p = (jnp.zeros((sd_pad, 512), jnp.float32)
           .at[:state_dim].set(w1)).astype(jnp.bfloat16)

    # Fuse action + value heads into one lane-padded (128, 128) weight.
    wh = jnp.zeros((128, 128), jnp.float32)
    wh = wh.at[:, :action_dim].set(wa).at[:, action_dim].set(wv[:, 0])
    bh = jnp.zeros((1, 128), jnp.float32)
    bh = bh.at[:, :action_dim].set(ba[0]).at[:, action_dim].set(bv[0, 0])

    return (w1p, b1,
            w2.astype(jnp.bfloat16), b2,
            w3.astype(jnp.bfloat16), b3,
            wh.astype(jnp.bfloat16), bh)


def actor_critic_forward(state, prepped, *, action_dim, tb=128):
    """state: (B, state_dim) f32. Returns (log_probs (B,A), state_value (B,1))."""
    w1, b1, w2, b2, w3, b3, wh, bh = prepped
    B, sd = state.shape
    sd_pad = w1.shape[0]
    b_pad = _round_up(B, tb)

    # Zero-pad batch to a multiple of TB and state_dim to 128 (once, outside).
    xp = jnp.zeros((b_pad, sd_pad), jnp.float32).at[:B, :sd].set(state)

    resident = lambda shape: pl.BlockSpec(shape, lambda i: (0, 0))

    out = pl.pallas_call(
        functools.partial(actor_critic_kernel, action_dim=action_dim),
        out_shape=jax.ShapeDtypeStruct((b_pad, 128), jnp.float32),
        grid=(b_pad // tb,),
        in_specs=[
            pl.BlockSpec((tb, sd_pad), lambda i: (i, 0)),   # states stream over B
            resident(w1.shape), resident(b1.shape),          # weights stay VMEM-resident
            resident(w2.shape), resident(b2.shape),
            resident(w3.shape), resident(b3.shape),
            resident(wh.shape), resident(bh.shape),
        ],
        out_specs=pl.BlockSpec((tb, 128), lambda i: (i, 0)),
        compiler_params=pltpu.CompilerParams(
            dimension_semantics=("parallel",)),              # megacore / v7x 2-TC split
    )(xp, w1, b1, w2, b2, w3, b3, wh, bh)

    log_probs = out[:B, :action_dim]
    state_value = out[:B, action_dim:action_dim + 1]
    return log_probs, state_value


def reference_forward(state, prepped, *, action_dim):
    """Pure-JAX reference with identical numerics (bf16 weights, f32 accum)."""
    w1, b1, w2, b2, w3, b3, wh, bh = prepped
    B, sd = state.shape
    x = jnp.zeros((B, w1.shape[0]), jnp.float32).at[:, :sd].set(state)
    h1 = jnp.maximum(jnp.dot(x.astype(jnp.bfloat16), w1,
                             preferred_element_type=jnp.float32) + b1, 0.0)
    h2 = jnp.maximum(jnp.dot(h1.astype(jnp.bfloat16), w2,
                             preferred_element_type=jnp.float32) + b2, 0.0)
    feat = jnp.maximum(jnp.dot(h2.astype(jnp.bfloat16), w3,
                               preferred_element_type=jnp.float32) + b3, 0.0)
    head = jnp.dot(feat.astype(jnp.bfloat16), wh,
                   preferred_element_type=jnp.float32) + bh
    logits = head[:, :action_dim]
    value = head[:, action_dim:action_dim + 1]
    logp = jax.nn.log_softmax(logits, axis=-1)
    return logp, value


def init_params(key, state_dim, action_dim):
    """Deterministic synthetic parameters (weights stored as (in, out))."""
    dims = [(state_dim, 512), (512, 256), (256, 128)]
    keys = jax.random.split(key, 5)
    params = []
    for k, (fi, fo) in zip(keys[:3], dims):
        kw, kb = jax.random.split(k)
        scale = 1.0 / jnp.sqrt(fi)
        params.append(jax.random.uniform(kw, (fi, fo), jnp.float32, -scale, scale))
        params.append(jax.random.uniform(kb, (1, fo), jnp.float32, -scale, scale))
    kw, kb = jax.random.split(keys[3])
    scale = 1.0 / jnp.sqrt(128)
    params.append(jax.random.uniform(kw, (128, action_dim), jnp.float32, -scale, scale))
    params.append(jax.random.uniform(kb, (1, action_dim), jnp.float32, -scale, scale))
    kw, kb = jax.random.split(keys[4])
    params.append(jax.random.uniform(kw, (128, 1), jnp.float32, -scale, scale))
    params.append(jax.random.uniform(kb, (1, 1), jnp.float32, -scale, scale))
    return tuple(params)


if __name__ == "__main__":
    state_dim = 16
    action_dim = 8
    batch = 256            # states from many envs/timesteps batched together
    tb = 128               # batch tile (use 256 on v6e/v7x for the 256-wide MXU)

    root = jax.random.PRNGKey(0)
    k_param, k_state, k_sample = jax.random.split(root, 3)

    params = init_params(k_param, state_dim, action_dim)
    prepped = prepare_params(params, state_dim, action_dim)
    states = jax.random.normal(k_state, (batch, state_dim), jnp.float32)

    fwd = jax.jit(functools.partial(actor_critic_forward,
                                    action_dim=action_dim, tb=tb))
    log_probs, values = fwd(states, prepped)
    log_probs = jax.block_until_ready(log_probs)
    values = jax.block_until_ready(values)

    # Correctness check vs a pure-JAX reference with the same numerics.
    ref_logp, ref_val = reference_forward(states, prepped, action_dim=action_dim)
    assert jnp.max(jnp.abs(log_probs - ref_logp)) < 2e-2
    assert jnp.max(jnp.abs(values - ref_val)) < 2e-2

    # Categorical(action_probs): sample actions, record log_probs and values.
    probs = jnp.exp(log_probs)
    assert float(jnp.max(jnp.abs(jnp.sum(probs, axis=-1) - 1.0))) < 1e-3
    actions = jax.random.categorical(k_sample, log_probs, axis=-1)        # (B,)
    chosen_logp = jnp.take_along_axis(log_probs, actions[:, None], axis=-1)[:, 0]

    _ = int(actions[0])            # action.item() for env 0
    _ = float(chosen_logp[0])      # recorded logprob
    _ = float(values[0, 0])        # recorded state value

    print("KERNEL_OK")
</pallas_src>

<mosaic_0001>
module attributes {stable_mosaic.version = 11 : i64} {
  func.func @actor_critic_kernel(%arg0: i32, %arg1: memref<128x128xf32, #tpu.memory_space<vmem>>, %arg2: memref<128x512xbf16, #tpu.memory_space<vmem>>, %arg3: memref<1x512xf32, #tpu.memory_space<vmem>>, %arg4: memref<512x256xbf16, #tpu.memory_space<vmem>>, %arg5: memref<1x256xf32, #tpu.memory_space<vmem>>, %arg6: memref<256x128xbf16, #tpu.memory_space<vmem>>, %arg7: memref<1x128xf32, #tpu.memory_space<vmem>>, %arg8: memref<128x128xbf16, #tpu.memory_space<vmem>>, %arg9: memref<1x128xf32, #tpu.memory_space<vmem>>, %arg10: memref<128x128xf32, #tpu.memory_space<vmem>>) attributes {dimension_semantics = [#tpu.dimension_semantics<parallel>], iteration_bounds = array<i64: 2>, scalar_prefetch = 0 : i64, scratch_operands = 0 : i64, tpu.core_type = #tpu.core_type<tc>, window_params = [{transform_indices = @transform_0, window_bounds = array<i64: 128, 128>}, {pipeline_mode = #tpu.pipeline_mode<synchronous>, transform_indices = @transform_1, window_bounds = array<i64: 128, 512>}, {pipeline_mode = #tpu.pipeline_mode<synchronous>, transform_indices = @transform_2, window_bounds = array<i64: 1, 512>}, {pipeline_mode = #tpu.pipeline_mode<synchronous>, transform_indices = @transform_3, window_bounds = array<i64: 512, 256>}, {pipeline_mode = #tpu.pipeline_mode<synchronous>, transform_indices = @transform_4, window_bounds = array<i64: 1, 256>}, {pipeline_mode = #tpu.pipeline_mode<synchronous>, transform_indices = @transform_5, window_bounds = array<i64: 256, 128>}, {pipeline_mode = #tpu.pipeline_mode<synchronous>, transform_indices = @transform_6, window_bounds = array<i64: 1, 128>}, {pipeline_mode = #tpu.pipeline_mode<synchronous>, transform_indices = @transform_7, window_bounds = array<i64: 128, 128>}, {pipeline_mode = #tpu.pipeline_mode<synchronous>, transform_indices = @transform_8, window_bounds = array<i64: 1, 128>}, {transform_indices = @transform_9, window_bounds = array<i64: 128, 128>}]} {
    %c0 = arith.constant 0 : index
    %c0_0 = arith.constant 0 : index
    %0 = vector.load %arg1[%c0, %c0_0] : memref<128x128xf32, #tpu.memory_space<vmem>>, vector<128x128xf32>
    %1 = arith.truncf %0 : vector<128x128xf32> to vector<128x128xbf16>
    %c0_1 = arith.constant 0 : index
    %c0_2 = arith.constant 0 : index
    %2 = vector.load %arg2[%c0_1, %c0_2] : memref<128x512xbf16, #tpu.memory_space<vmem>>, vector<128x512xbf16>
    %cst = arith.constant dense<0.000000e+00> : vector<128x512xf32>
    %3 = tpu.matmul %1, %2, %cst {dimension_numbers = #tpu.dot_dimension_numbers<[1], [0], [0], [1], [0, 0, 1, 1], [], []>} : vector<128x128xbf16>, vector<128x512xbf16>, vector<128x512xf32> -> vector<128x512xf32>
    %c0_3 = arith.constant 0 : index
    %c0_4 = arith.constant 0 : index
    %4 = vector.load %arg3[%c0_3, %c0_4] : memref<1x512xf32, #tpu.memory_space<vmem>>, vector<1x512xf32>
    %5 = vector.broadcast %4 : vector<1x512xf32> to vector<128x512xf32>
    %6 = arith.addf %3, %5 : vector<128x512xf32>
    %cst_5 = arith.constant 0.000000e+00 : f32
    %7 = vector.broadcast %cst_5 : f32 to vector<128x512xf32>
    %8 = arith.maximumf %6, %7 : vector<128x512xf32>
    %9 = arith.truncf %8 : vector<128x512xf32> to vector<128x512xbf16>
    %c0_6 = arith.constant 0 : index
    %c0_7 = arith.constant 0 : index
    %10 = vector.load %arg4[%c0_6, %c0_7] : memref<512x256xbf16, #tpu.memory_space<vmem>>, vector<512x256xbf16>
    %cst_8 = arith.constant dense<0.000000e+00> : vector<128x256xf32>
    %11 = tpu.matmul %9, %10, %cst_8 {dimension_numbers = #tpu.dot_dimension_numbers<[1], [0], [0], [1], [0, 0, 1, 1], [], []>} : vector<128x512xbf16>, vector<512x256xbf16>, vector<128x256xf32> -> vector<128x256xf32>
    %c0_9 = arith.constant 0 : index
    %c0_10 = arith.constant 0 : index
    %12 = vector.load %arg5[%c0_9, %c0_10] : memref<1x256xf32, #tpu.memory_space<vmem>>, vector<1x256xf32>
    %13 = vector.broadcast %12 : vector<1x256xf32> to vector<128x256xf32>
    %14 = arith.addf %11, %13 : vector<128x256xf32>
    %cst_11 = arith.constant 0.000000e+00 : f32
    %15 = vector.broadcast %cst_11 : f32 to vector<128x256xf32>
    %16 = arith.maximumf %14, %15 : vector<128x256xf32>
    %17 = arith.truncf %16 : vector<128x256xf32> to vector<128x256xbf16>
    %c0_12 = arith.constant 0 : index
    %c0_13 = arith.constant 0 : index
    %18 = vector.load %arg6[%c0_12, %c0_13] : memref<256x128xbf16, #tpu.memory_space<vmem>>, vector<256x128xbf16>
    %cst_14 = arith.constant dense<0.000000e+00> : vector<128x128xf32>
    %19 = tpu.matmul %17, %18, %cst_14 {dimension_numbers = #tpu.dot_dimension_numbers<[1], [0], [0], [1], [0, 0, 1, 1], [], []>} : vector<128x256xbf16>, vector<256x128xbf16>, vector<128x128xf32> -> vector<128x128xf32>
    %c0_15 = arith.constant 0 : index
    %c0_16 = arith.constant 0 : index
    %20 = vector.load %arg7[%c0_15, %c0_16] : memref<1x128xf32, #tpu.memory_space<vmem>>, vector<1x128xf32>
    %21 = vector.broadcast %20 : vector<1x128xf32> to vector<128x128xf32>
    %22 = arith.addf %19, %21 : vector<128x128xf32>
    %cst_17 = arith.constant 0.000000e+00 : f32
    %23 = vector.broadcast %cst_17 : f32 to vector<128x128xf32>
    %24 = arith.maximumf %22, %23 : vector<128x128xf32>
    %25 = arith.truncf %24 : vector<128x128xf32> to vector<128x128xbf16>
    %c0_18 = arith.constant 0 : index
    %c0_19 = arith.constant 0 : index
    %26 = vector.load %arg8[%c0_18, %c0_19] : memref<128x128xbf16, #tpu.memory_space<vmem>>, vector<128x128xbf16>
    %cst_20 = arith.constant dense<0.000000e+00> : vector<128x128xf32>
    %27 = tpu.matmul %25, %26, %cst_20 {dimension_numbers = #tpu.dot_dimension_numbers<[1], [0], [0], [1], [0, 0, 1, 1], [], []>} : vector<128x128xbf16>, vector<128x128xbf16>, vector<128x128xf32> -> vector<128x128xf32>
    %c0_21 = arith.constant 0 : index
    %c0_22 = arith.constant 0 : index
    %28 = vector.load %arg9[%c0_21, %c0_22] : memref<1x128xf32, #tpu.memory_space<vmem>>, vector<1x128xf32>
    %29 = vector.broadcast %28 : vector<1x128xf32> to vector<128x128xf32>
    %30 = arith.addf %27, %29 : vector<128x128xf32>
    %31 = tpu.iota {dimensions = array<i32: 1>} : vector<128x128xi32>
    %c8_i32 = arith.constant 8 : i32
    %32 = vector.broadcast %c8_i32 : i32 to vector<128x128xi32>
    %33 = arith.cmpi slt, %31, %32 : vector<128x128xi32>
    %cst_23 = arith.constant -1.000000e+30 : f32
    %34 = vector.broadcast %cst_23 : f32 to vector<128x128xf32>
    %35 = arith.select %33, %30, %34 : vector<128x128xi1>, vector<128x128xf32>
    %cst_24 = arith.constant dense<0xFF800000> : vector<128xf32>
    %36 = vector.multi_reduction <maximumf>, %35, %cst_24 [1] : vector<128x128xf32> to vector<128xf32>
    %37 = vector.shape_cast %36 : vector<128xf32> to vector<128x1xf32>
    %38 = vector.broadcast %37 : vector<128x1xf32> to vector<128x128xf32>
    %39 = arith.subf %35, %38 : vector<128x128xf32>
    %40 = math.exp %39 : vector<128x128xf32>
    %cst_25 = arith.constant dense<0.000000e+00> : vector<128xf32>
    %41 = vector.multi_reduction <add>, %40, %cst_25 [1] : vector<128x128xf32> to vector<128xf32>
    %42 = vector.shape_cast %41 : vector<128xf32> to vector<128x1xf32>
    %43 = math.log %42 : vector<128x1xf32>
    %44 = vector.broadcast %43 : vector<128x1xf32> to vector<128x128xf32>
    %45 = arith.subf %39, %44 : vector<128x128xf32>
    %46 = arith.select %33, %45, %30 : vector<128x128xi1>, vector<128x128xf32>
    %c0_26 = arith.constant 0 : index
    %c0_27 = arith.constant 0 : index
    %47 = vector.load %arg10[%c0_26, %c0_27] : memref<128x128xf32, #tpu.memory_space<vmem>>, vector<128x128xf32>
    tpu.vector_store %arg10[%c0_26, %c0_27], %46 {strides = array<i32>} : memref<128x128xf32, #tpu.memory_space<vmem>>, vector<128x128xf32>,
    return
  }
  func.func @transform_0(%arg0: i32) -> (i32, i32) {
    %c0_i32 = arith.constant 0 : i32
    %c0_i32_0 = arith.constant 0 : i32
    return %arg0, %c0_i32 : i32, i32
  }
  func.func @transform_1(%arg0: i32) -> (i32, i32) {
    %c0_i32 = arith.constant 0 : i32
    %c0_i32_0 = arith.constant 0 : i32
    %c0_i32_1 = arith.constant 0 : i32
    return %c0_i32, %c0_i32_0 : i32, i32
  }
  func.func @transform_2(%arg0: i32) -> (i32, i32) {
    %c0_i32 = arith.constant 0 : i32
    %c0_i32_0 = arith.constant 0 : i32
    %c0_i32_1 = arith.constant 0 : i32
    return %c0_i32, %c0_i32_0 : i32, i32
  }
  func.func @transform_3(%arg0: i32) -> (i32, i32) {
    %c0_i32 = arith.constant 0 : i32
    %c0_i32_0 = arith.constant 0 : i32
    %c0_i32_1 = arith.constant 0 : i32
    return %c0_i32, %c0_i32_0 : i32, i32
  }
  func.func @transform_4(%arg0: i32) -> (i32, i32) {
    %c0_i32 = arith.constant 0 : i32
    %c0_i32_0 = arith.constant 0 : i32
    %c0_i32_1 = arith.constant 0 : i32
    return %c0_i32, %c0_i32_0 : i32, i32
  }
  func.func @transform_5(%arg0: i32) -> (i32, i32) {
    %c0_i32 = arith.constant 0 : i32
    %c0_i32_0 = arith.constant 0 : i32
    %c0_i32_1 = arith.constant 0 : i32
    return %c0_i32, %c0_i32_0 : i32, i32
  }
  func.func @transform_6(%arg0: i32) -> (i32, i32) {
    %c0_i32 = arith.constant 0 : i32
    %c0_i32_0 = arith.constant 0 : i32
    %c0_i32_1 = arith.constant 0 : i32
    return %c0_i32, %c0_i32_0 : i32, i32
  }
  func.func @transform_7(%arg0: i32) -> (i32, i32) {
    %c0_i32 = arith.constant 0 : i32
    %c0_i32_0 = arith.constant 0 : i32
    %c0_i32_1 = arith.constant 0 : i32
    return %c0_i32, %c0_i32_0 : i32, i32
  }
  func.func @transform_8(%arg0: i32) -> (i32, i32) {
    %c0_i32 = arith.constant 0 : i32
    %c0_i32_0 = arith.constant 0 : i32
    %c0_i32_1 = arith.constant 0 : i32
    return %c0_i32, %c0_i32_0 : i32, i32
  }
  func.func @transform_9(%arg0: i32) -> (i32, i32) {
    %c0_i32 = arith.constant 0 : i32
    %c0_i32_0 = arith.constant 0 : i32
    return %arg0, %c0_i32 : i32, i32
  }
}

</mosaic_0001>

<bundles_post_ra>
// kernel: actor_critic_forward.1
= control target key start
LH: loop header
LB: loop body
LE: loop exit
PB: predicated region body
PF: predicated region fallthrough
CT: control target
= control target key end

     0   :  { %s2867_s30 = smov 0   ;;  %s3722_s0 = inlined_call_operand.vmem [shape: f32[256,128], index: 0, kind: input, shape index: {}]   ;;  %s3723_s1 = inlined_call_operand.vmem [shape: bf16[128,512], index: 1, kind: input, shape index: {}]   ;;  %s3724_s2 = inlined_call_operand.vmem [shape: f32[1,512], index: 2, kind: input, shape index: {}]   ;;  %s3725_s3 = inlined_call_operand.vmem [shape: bf16[512,256], index: 3, kind: input, shape index: {}]   ;;  %s3726_s4 = inlined_call_operand.vmem [shape: f32[1,256], index: 4, kind: input, shape index: {}]   ;;  %s3727_s5 = inlined_call_operand.vmem [shape: bf16[256,128], index: 5, kind: input, shape index: {}]   ;;  %s3728_s6 = inlined_call_operand.vmem [shape: f32[1,128], index: 6, kind: input, shape index: {}]   ;;  %s3729_s7 = inlined_call_operand.vmem [shape: bf16[128,128], index: 7, kind: input, shape index: {}]   ;;  %s3730_s8 = inlined_call_operand.vmem [shape: f32[1,128], index: 8, kind: input, shape index: {}]   ;;  %s3731_s9 = inlined_call_operand.vmem [shape: f32[256,128], index: 9, kind: output, shape index: {}]  }
   0x1 LB: > { %s2258_s10 = sadd.s32 4294967295, %s2814_s30   ;;  %p2262_p0 = scmp.ge.s32.totalorder %s2814_s30, 1  ;;  %s2814_s30 = sphi %s2867_s30, %s19_s30  }
   0x2   : > { %p288_p1 = scmp.lt.s32.totalorder %s2814_s30, 3 }
   0x4   : > { %p289_p2 = pnand %p2262_p0, %p288_p1 }
   0x5   : > { %v2576_v0 = vld [vmem:[%s3723_s1 + $0x4] ss:$16 sps:$4 sm:$0xff] (!%p289_p2)   ;;  %v2578_v1 = vld [vmem:[%s3723_s1] ss:$16 sps:$4 sm:$0xff] (!%p289_p2)   ;;  %v2816_v2 = vmov (!%p289_p2), 0   ;;  %s2263_s25 = sshll.u32 (!%p289_p2), %s2258_s10, 4 }
   0x6   : > { %292 = sbr.rel (%p289_p2) target bundleno = 1364 (0x554), region = 56  ;;  %607 = vmatprep.mubr.bf16.mxu0 (!%p289_p2), %v2816_v2  ;;  %720 = vmatprep.mubr.bf16.mxu1 (!%p289_p2), %v2816_v2  ;;  %v2579_v3 = vld [vmem:[%s3723_s1 + $0x24] ss:$16 sps:$4 sm:$0xff] (!%p289_p2)   ;;  %v2581_v4 = vld [vmem:[%s3723_s1 + $0x20] ss:$16 sps:$4 sm:$0xff] (!%p289_p2)   ;;  %p325_p3 = scmp.lt.s32.totalorder (!%p289_p2), %s2263_s25, 31 }
   0x7   : > { %575 = vmatprep.subr.bf16.mxu0 (!%p289_p2), %v2576_v0  ;;  %v2582_v5 = vld [vmem:[%s3723_s1 + $0x44] ss:$16 sps:$4 sm:$0xff] (!%p289_p2)   ;;  %v2584_v6 = vld [vmem:[%s3723_s1 + $0x40] ss:$16 sps:$4 sm:$0xff] (!%p289_p2)   ;;  %v2600_v10 = vld [vmem:[%s3723_s1 + $0xc] ss:$16 sps:$4 sm:$0xff] (!%p289_p2)  }
   0x8   : > { %576 = vmatpush1.bf16.msra.mxu0 (!%p289_p2), %v2578_v1  ;;  %v2585_v7 = vld [vmem:[%s3723_s1 + $0x64] ss:$16 sps:$4 sm:$0xff] (!%p289_p2)   ;;  %v2587_v8 = vld [vmem:[%s3723_s1 + $0x60] ss:$16 sps:$4 sm:$0xff] (!%p289_p2)   ;;  %v2602_v11 = vld [vmem:[%s3723_s1 + $0x8] ss:$16 sps:$4 sm:$0xff] (!%p289_p2)   ;;  %688 = vmatprep.subr.bf16.mxu1 (!%p289_p2), %v2600_v10 }
   0x9   : > { %577 = vmatprep.subr.bf16.mxu0 (!%p289_p2), %v2579_v3  ;;  %v2588_v9 = vld [vmem:[%s3723_s1 + $0x84] ss:$16 sps:$4 sm:$0xff] (!%p289_p2)   ;;  %v2590_v12 = vld [vmem:[%s3723_s1 + $0x80] ss:$16 sps:$4 sm:$0xff] (!%p289_p2)   ;;  %v2603_v14 = vld [vmem:[%s3723_s1 + $0x2c] ss:$16 sps:$4 sm:$0xff] (!%p289_p2)   ;;  %689 = vmatpush1.bf16.msra.mxu1 (!%p289_p2), %v2602_v11 }
   0xa   : > { %v2591_v13 = vld [vmem:[%s3723_s1 + $0xa4] ss:$16 sps:$4 sm:$0xff] (!%p289_p2)   ;;  %v2605_v15 = vld [vmem:[%s3723_s1 + $0x28] ss:$16 sps:$4 sm:$0xff] (!%p289_p2)   ;;  %690 = vmatprep.subr.bf16.mxu1 (!%p289_p2), %v2603_v14  ;;  %v2606_v16 = vld [vmem:[%s3723_s1 + $0x4c] ss:$16 sps:$4 sm:$0xff] (!%p289_p2)  }
   0xb   : > { %v2593_v17 = vld [vmem:[%s3723_s1 + $0xa0] ss:$16 sps:$4 sm:$0xff] (!%p289_p2)   ;;  %v2594_v18 = vld [vmem:[%s3723_s1 + $0xc4] ss:$16 sps:$4 sm:$0xff] (!%p289_p2)   ;;  %v2608_v19 = vld [vmem:[%s3723_s1 + $0x48] ss:$16 sps:$4 sm:$0xff] (!%p289_p2)  }
   0xc   : > { %578 = vmatpush1.bf16.msra.mxu0 (!%p289_p2), %v2581_v4  ;;  %v2609_v20 = vld [vmem:[%s3723_s1 + $0x6c] ss:$16 sps:$4 sm:$0xff] (!%p289_p2)   ;;  %v2596_v21 = vld [vmem:[%s3723_s1 + $0xc0] ss:$16 sps:$4 sm:$0xff] (!%p289_p2)   ;;  %v2597_v22 = vld [vmem:[%s3723_s1 + $0xe4] ss:$16 sps:$4 sm:$0xff] (!%p289_p2)  }
   0xd   : > { %579 = vmatprep.subr.bf16.mxu0 %v2582_v5  ;;  %s3733_s25 = smov (!%p325_p3, %s2263_s25), 31  ;;  %691 = vmatpush1.bf16.msra.mxu1 %v2605_v15  ;;  %v2611_v23 = vld [vmem:[%s3723_s1 + $0x68] ss:$16 sps:$4 sm:$0xff]   ;;  %v2599_v24 = vld [vmem:[%s3723_s1 + $0xe0] ss:$16 sps:$4 sm:$0xff]  }
   0xe   : > { %s2264_s29 = sshll.u32 %s3733_s25, 3  ;;  %692 = vmatprep.subr.bf16.mxu1 %v2606_v16  ;;  %v2612_v25 = vld [vmem:[%s3723_s1 + $0x8c] ss:$16 sps:$4 sm:$0xff]   ;;  %v2614_v29 = vld [vmem:[%s3723_s1 + $0x88] ss:$16 sps:$4 sm:$0xff]  }
   0xf   : > { %s2951_s20 = scalar_lea.vmem %s3722_s0, %s2264_s29  ;;  %v2626_v28 = vld [vmem:[%s3725_s3 + $0x4] ss:$8 sps:$4 sm:$0xff]   ;;  %v2624_v32 = vld [vmem:[%s3725_s3] ss:$8 sps:$4 sm:$0xff]   ;;  %v2629_v33 = vld [vmem:[%s3725_s3 + $0x14] ss:$8 sps:$4 sm:$0xff]   ;;  %s3637_s10 = scalar_lea.vmem %s3731_s9, %s2264_s29 }
  0x10   : > { %580 = vmatpush1.bf16.msra.mxu0 %v2584_v6  ;;  %v337_v26 = vld [vmem:[%s2951_s20] sm:$0xff]  ;;  %v338_v27 = vld [vmem:[%s2951_s20 + $0x8] sm:$0xff]  ;;  %v339_v35 = vld [vmem:[%s2951_s20 + $0x10] sm:$0xff] }
  0x11   : > { %581 = vmatprep.subr.bf16.mxu0 %v2585_v7  ;;  %693 = vmatpush1.bf16.msra.mxu1 %v2608_v19  ;;  %v353_v30 = vpack.c.bf16 %v338_v27, %v337_v26  ;;  %v2615_v31 = vld [vmem:[%s3723_s1 + $0xac] ss:$16 sps:$4 sm:$0xff]   ;;  %v2617_v34 = vld [vmem:[%s3723_s1 + $0xa8] ss:$16 sps:$4 sm:$0xff]   ;;  %v341_v46 = vld [vmem:[%s2951_s20 + $0x20] sm:$0xff]  ;;  %v395_v26 = vlaneseq }
  0x12   : > { %694 = vmatprep.subr.bf16.mxu1 %v2609_v20  ;;  %v2618_v36 = vld [vmem:[%s3723_s1 + $0xcc] ss:$16 sps:$4 sm:$0xff]   ;;  %v2627_v38 = vld [vmem:[%s3725_s3 + $0x10] ss:$8 sps:$4 sm:$0xff]   ;;  %v2630_v43 = vld [vmem:[%s3725_s3 + $0x20] ss:$8 sps:$4 sm:$0xff]  }
  0x13   : > { %v340_v37 = vld [vmem:[%s2951_s20 + $0x18] sm:$0xff]  ;;  %v2632_v39 = vld [vmem:[%s3725_s3 + $0x24] ss:$8 sps:$4 sm:$0xff]   ;;  %v2636_v50 = vld [vmem:[%s3725_s3 + $0x40] ss:$8 sps:$4 sm:$0xff]   ;;  %v3113_v27 = vshrl.u32 %v395_v26, 7 }
  0x14   : > { %582 = vmatpush1.bf16.msra.mxu0 %v2587_v8  ;;  %v2620_v40 = vld [vmem:[%s3723_s1 + $0xc8] ss:$16 sps:$4 sm:$0xff]   ;;  %v354_v41 = vpack.c.bf16 %v340_v37, %v339_v35  ;;  %v2621_v42 = vld [vmem:[%s3723_s1 + $0xec] ss:$16 sps:$4 sm:$0xff]   ;;  %v343_v53 = vld [vmem:[%s2951_s20 + $0x30] sm:$0xff] }
  0x15   : > { %583 = vmatprep.subr.bf16.mxu0 %v2588_v9  ;;  %695 = vmatpush1.bf16.msra.mxu1 %v2611_v23  ;;  %v2635_v44 = vld [vmem:[%s3725_s3 + $0x34] ss:$8 sps:$4 sm:$0xff]   ;;  %v2623_v45 = vld [vmem:[%s3723_s1 + $0xe8] ss:$16 sps:$4 sm:$0xff]   ;;  %v2638_v49 = vld [vmem:[%s3725_s3 + $0x44] ss:$8 sps:$4 sm:$0xff]  }
  0x16   : > { %696 = vmatprep.subr.bf16.mxu1 %v2612_v25  ;;  %v342_v47 = vld [vmem:[%s2951_s20 + $0x28] sm:$0xff]  ;;  %v2633_v48 = vld [vmem:[%s3725_s3 + $0x30] ss:$8 sps:$4 sm:$0xff]   ;;  %v2641_v52 = vld [vmem:[%s3725_s3 + $0x54] ss:$8 sps:$4 sm:$0xff]  }
  0x17   : > { %v355_v51 = vpack.c.bf16 %v342_v47, %v341_v46  ;;  %v344_v54 = vld [vmem:[%s2951_s20 + $0x38] sm:$0xff]  ;;  %v2644_v56 = vld [vmem:[%s3725_s3 + $0x64] ss:$8 sps:$4 sm:$0xff]   ;;  %v2642_v57 = vld [vmem:[%s3725_s3 + $0x60] ss:$8 sps:$4 sm:$0xff]  }
  0x18   : > { %584 = vmatpush1.bf16.msra.mxu0 %v2590_v12  ;;  %v2639_v55 = vld [vmem:[%s3725_s3 + $0x50] ss:$8 sps:$4 sm:$0xff]   ;;  %v356_v58 = vpack.c.bf16 %v344_v54, %v343_v53  ;;  %v2647_v59 = vld [vmem:[%s3725_s3 + $0x74] ss:$8 sps:$4 sm:$0xff]   ;;  %v345_v60 = vld [vmem:[%s2951_s20 + $0x40] sm:$0xff] }
  0x19   : > { %585 = vmatprep.subr.bf16.mxu0 %v2591_v13  ;;  %697 = vmatpush1.bf16.msra.mxu1 %v2614_v29  ;;  %v346_v61 = vld [vmem:[%s2951_s20 + $0x48] sm:$0xff]  ;;  %v2645_v62 = vld [vmem:[%s3725_s3 + $0x70] ss:$8 sps:$4 sm:$0xff]   ;;  %v2653_v3 = vld [vmem:[%s3725_s3 + $0x94] ss:$8 sps:$4 sm:$0xff]  }
  0x1a   : > { %698 = vmatprep.subr.bf16.mxu1 %v2615_v31  ;;  %v2650_v63 = vld [vmem:[%s3725_s3 + $0x84] ss:$8 sps:$4 sm:$0xff]   ;;  %v2648_v0 = vld [vmem:[%s3725_s3 + $0x80] ss:$8 sps:$4 sm:$0xff]   ;;  %v357_v1 = vpack.c.bf16 %v346_v61, %v345_v60  ;;  %v347_v4 = vld [vmem:[%s2951_s20 + $0x50] sm:$0xff] }
  0x1b   : > { %v348_v5 = vld [vmem:[%s2951_s20 + $0x58] sm:$0xff]  ;;  %v2656_v7 = vld [vmem:[%s3725_s3 + $0xa4] ss:$8 sps:$4 sm:$0xff]   ;;  %v2654_v8 = vld [vmem:[%s3725_s3 + $0xa0] ss:$8 sps:$4 sm:$0xff]  }
  0x1c   : > { %586 = vmatpush1.bf16.msra.mxu0 %v2593_v17  ;;  %v2651_v6 = vld [vmem:[%s3725_s3 + $0x90] ss:$8 sps:$4 sm:$0xff]   ;;  %v358_v9 = vpack.c.bf16 %v348_v5, %v347_v4  ;;  %v2659_v10 = vld [vmem:[%s3725_s3 + $0xb4] ss:$8 sps:$4 sm:$0xff]   ;;  %v349_v11 = vld [vmem:[%s2951_s20 + $0x60] sm:$0xff] }
  0x1d   : > { %587 = vmatprep.subr.bf16.mxu0 %v2594_v18  ;;  %699 = vmatpush1.bf16.msra.mxu1 %v2617_v34  ;;  %v350_v12 = vld [vmem:[%s2951_s20 + $0x68] sm:$0xff]  ;;  %v2657_v13 = vld [vmem:[%s3725_s3 + $0xb0] ss:$8 sps:$4 sm:$0xff]   ;;  %v2665_v17 = vld [vmem:[%s3725_s3 + $0xd4] ss:$8 sps:$4 sm:$0xff]  }
  0x1e   : > { %700 = vmatprep.subr.bf16.mxu1 %v2618_v36  ;;  %v2662_v14 = vld [vmem:[%s3725_s3 + $0xc4] ss:$8 sps:$4 sm:$0xff]   ;;  %v359_v15 = vpack.c.bf16 %v350_v12, %v349_v11  ;;  %v2660_v16 = vld [vmem:[%s3725_s3 + $0xc0] ss:$8 sps:$4 sm:$0xff]   ;;  %v351_v18 = vld [vmem:[%s2951_s20 + $0x70] sm:$0xff] }
  0x1f   : > { %v352_v19 = vld [vmem:[%s2951_s20 + $0x78] sm:$0xff]  ;;  %v2666_v23 = vld [vmem:[%s3725_s3 + $0xe0] ss:$8 sps:$4 sm:$0xff]   ;;  %v2725_v61 = vld [vmem:[%s3727_s5 + $0x10] sm:$0xff]  }
  0x20   : > { %588 = vmatpush1.bf16.msra.mxu0 %v2596_v21  ;;  %v2663_v20 = vld [vmem:[%s3725_s3 + $0xd0] ss:$8 sps:$4 sm:$0xff]   ;;  %v360_v21 = vpack.c.bf16 %v352_v19, %v351_v18  ;;  %v393_v29 = vld [vmem:[%s3724_s2] sm:$0xf] }
  0x21   : > { %589 = vmatprep.subr.bf16.mxu0 %v2597_v22  ;;  %701 = vmatpush1.bf16.msra.mxu1 %v2620_v40  ;;  %v2668_v22 = vld [vmem:[%s3725_s3 + $0xe4] ss:$8 sps:$4 sm:$0xff]   ;;  %v2669_v25 = vld [vmem:[%s3725_s3 + $0xf0] ss:$8 sps:$4 sm:$0xff]   ;;  %v2672_v54 = vld [vmem:[%s3725_s3 + $0x100] ss:$8 sps:$4 sm:$0xff]  }
  0x22   : > { %702 = vmatprep.subr.bf16.mxu1 %v2621_v42  ;;  %v2720_v40 = vld [vmem:[%s3727_s5 + $0x40] sm:$0xff]   ;;  %v2722_v42 = vld [vmem:[%s3727_s5 + $0x48] sm:$0xff]   ;;  %v2675_v4 = vld [vmem:[%s3725_s3 + $0x110] ss:$8 sps:$4 sm:$0xff]  }
  0x23   : > { %v2727_v12 = vld [vmem:[%s3727_s5 + $0x18] sm:$0xff]   ;;  %v2678_v19 = vld [vmem:[%s3725_s3 + $0x120] ss:$8 sps:$4 sm:$0xff]  }
  0x24   : > { %590 = vmatpush1.bf16.msra.mxu0 %v2599_v24  ;;  %v2671_v24 = vld [vmem:[%s3725_s3 + $0xf4] ss:$8 sps:$4 sm:$0xff]  }
  0x25   : > { %1293 = vmatprep.subr.bf16.mxu0 %v2626_v28  ;;  %703 = vmatpush1.bf16.msra.mxu1 %v2623_v45  ;;  %v397_v28 = vsub.s32 0, %v3113_v27 }
  0x26   : > { %2391 = vmatprep.subr.bf16.mxu1 %v2720_v40 }
  0x27   : > { %608 = vmatmul.mubr.bf16.vlgmr.msra.gmra.mrb[0].mxu0 %v353_v30  ;;  %v3122_v31 = vrot.slane %v393_v29, %v397_v28 }
  0x28   : > { %617 = vmatprep.mubr.bf16.mxu0 %v2816_v2  ;;  %1294 = vmatpush1.bf16.msra.mxu0 %v2624_v32 }
  0x29   : > { %1295 = vmatprep.subr.bf16.mxu0 %v2629_v33  ;;  %721 = vmatmul.mubr.bf16.vlgmr.msra.gmra.mrb[0].mxu1 %v353_v30  ;;  %v401_v30 = vsub.s32 1, %v3113_v27 }
  0x2a   : > { %730 = vmatprep.mubr.bf16.mxu1 %v2816_v2 }
  0x2b   : > { %v3126_v32 = vrot.slane %v393_v29, %v401_v30 }
  0x2c   : > { %1296 = vmatpush1.bf16.msra.mxu0 %v2627_v38 }
  0x2d   : > { %1297 = vmatprep.subr.bf16.mxu0 %v2632_v39 }
  0x2f   : > { %618 = vmatmul.mubr.bf16.gmra.mrb[4].mxu0 %v354_v41 }
  0x30   : > { %627 = vmatprep.mubr.bf16.mxu0 %v2816_v2  ;;  %1298 = vmatpush1.bf16.msra.mxu0 %v2630_v43 }
  0x31   : > { %1299 = vmatprep.subr.bf16.mxu0 %v2635_v44  ;;  %731 = vmatmul.mubr.bf16.gmra.mrb[4].mxu1 %v354_v41  ;;  %v2721_v41 = vld [vmem:[%s3727_s5] sm:$0xff]  }
  0x32   : > { %740 = vmatprep.mubr.bf16.mxu1 %v2816_v2  ;;  %2392 = vmatpush3.bf16.msra.mxu1 %v2721_v41  ;;  %v2730_v41 = vld [vmem:[%s3727_s5 + $0x68] sm:$0xff]  }
  0x33   : > { %2393 = vmatprep.subr.bf16.mxu1 %v2722_v42 }
  0x34   : > { %1300 = vmatpush1.bf16.msra.mxu0 %v2633_v48  ;;  %v2723_v48 = vld [vmem:[%s3727_s5 + $0x8] sm:$0xff]  }
  0x35   : > { %1301 = vmatprep.subr.bf16.mxu0 %v2638_v49 }
  0x36   : > { %2394 = vmatpush3.bf16.msra.mxu1 %v2723_v48 }
  0x37   : > { %628 = vmatmul.mubr.bf16.gmra.mrb[8].mxu0 %v355_v51 }
  0x38   : > { %637 = vmatprep.mubr.bf16.mxu0 %v2816_v2  ;;  %1302 = vmatpush1.bf16.msra.mxu0 %v2636_v50  ;;  %v405_v50 = vsub.s32 2, %v3113_v27 }
  0x39   : > { %1303 = vmatprep.subr.bf16.mxu0 %v2641_v52  ;;  %741 = vmatmul.mubr.bf16.gmra.mrb[8].mxu1 %v355_v51  ;;  %v2724_v51 = vld [vmem:[%s3727_s5 + $0x50] sm:$0xff]  }
  0x3a   : > { %750 = vmatprep.mubr.bf16.mxu1 %v2816_v2  ;;  %2395 = vmatprep.subr.bf16.mxu1 %v2724_v51 }
  0x3b   : > { %2396 = vmatpush3.bf16.msra.mxu1 %v2725_v61 }
  0x3c   : > { %1304 = vmatpush1.bf16.msra.mxu0 %v2639_v55  ;;  %v409_v55 = vsub.s32 3, %v3113_v27 }
  0x3d   : > { %1305 = vmatprep.subr.bf16.mxu0 %v2644_v56 }
  0x3e   : > { %v3170_v5 = vrot.slane %v393_v29, %v409_v55 }
  0x3f   : > { %638 = vmatmul.mubr.bf16.gmra.mrb[12].mxu0 %v356_v58 }
  0x40   : > { %647 = vmatprep.mubr.bf16.mxu0 %v2816_v2  ;;  %1306 = vmatpush1.bf16.msra.mxu0 %v2642_v57 }
  0x41   : > { %1307 = vmatprep.subr.bf16.mxu0 %v2647_v59  ;;  %751 = vmatmul.mubr.bf16.gmra.mrb[12].mxu1 %v356_v58  ;;  %v2677_v58 = vld [vmem:[%s3725_s3 + $0x114] ss:$8 sps:$4 sm:$0xff]  }
  0x42   : > { %760 = vmatprep.mubr.bf16.mxu1 %v2816_v2 }
  0x44   : > { %1308 = vmatpush1.bf16.msra.mxu0 %v2645_v62 }
  0x45   : > { %1309 = vmatprep.subr.bf16.mxu0 %v2650_v63 }
  0x47   : > { %648 = vmatmul.mubr.bf16.gmra.mrb[16].mxu0 %v357_v1 }
  0x48   : > { %657 = vmatprep.mubr.bf16.mxu0 %v2816_v2  ;;  %1310 = vmatpush1.bf16.msra.mxu0 %v2648_v0  ;;  %v3161_v0 = vrot.slane %v393_v29, %v405_v50 }
  0x49   : > { %1311 = vmatprep.subr.bf16.mxu0 %v2653_v3  ;;  %761 = vmatmul.mubr.bf16.gmra.mrb[16].mxu1 %v357_v1  ;;  %v2726_v1 = vld [vmem:[%s3727_s5 + $0x58] sm:$0xff]  }
  0x4a   : > { %770 = vmatprep.mubr.bf16.mxu1 %v2816_v2  ;;  %2397 = vmatprep.subr.bf16.mxu1 %v2726_v1 }
  0x4b   : > { %2398 = vmatpush3.bf16.msra.mxu1 %v2727_v12  ;;  %v2733_v12 = vld [vmem:[%s3727_s5 + $0x30] sm:$0xff]  }
  0x4c   : > { %1312 = vmatpush1.bf16.msra.mxu0 %v2651_v6 }
  0x4d   : > { %1313 = vmatprep.subr.bf16.mxu0 %v2656_v7 }
  0x4f   : > { %658 = vmatmul.mubr.bf16.gmra.mrb[20].mxu0 %v358_v9 }
  0x50   : > { %667 = vmatprep.mubr.bf16.mxu0 %v2816_v2  ;;  %1314 = vmatpush1.bf16.msra.mxu0 %v2654_v8  ;;  %v2680_v8 = vld [vmem:[%s3725_s3 + $0x124] ss:$8 sps:$4 sm:$0xff]  }
  0x51   : > { %1315 = vmatprep.subr.bf16.mxu0 %v2659_v10  ;;  %771 = vmatmul.mubr.bf16.gmra.mrb[20].mxu1 %v358_v9 }
  0x52   : > { %780 = vmatprep.mubr.bf16.mxu1 %v2816_v2 }
  0x54   : > { %1316 = vmatpush1.bf16.msra.mxu0 %v2657_v13 }
  0x55   : > { %1317 = vmatprep.subr.bf16.mxu0 %v2662_v14 }
  0x57   : > { %668 = vmatmul.mubr.bf16.gmra.mrb[24].mxu0 %v359_v15 }
  0x58   : > { %677 = vmatprep.mubr.bf16.mxu0 %v2816_v2  ;;  %1318 = vmatpush1.bf16.msra.mxu0 %v2660_v16  ;;  %v2728_v16 = vld [vmem:[%s3727_s5 + $0x60] sm:$0xff]  }
  0x59   : > { %1319 = vmatprep.subr.bf16.mxu0 %v2665_v17  ;;  %781 = vmatmul.mubr.bf16.gmra.mrb[24].mxu1 %v359_v15 }
  0x5a   : > { %790 = vmatprep.mubr.bf16.mxu1 %v2816_v2  ;;  %v2674_v2 = vld [vmem:[%s3725_s3 + $0x104] ss:$8 sps:$4 sm:$0xff]   ;;  %2399 = vmatprep.subr.bf16.mxu1 %v2728_v16 }
  0x5c   : > { %1320 = vmatpush1.bf16.msra.mxu0 %v2663_v20 }
  0x5d   : > { %1321 = vmatprep.subr.bf16.mxu0 %v2668_v22 }
  0x5f   : > { %678 = vmatmul.mubr.bf16.gmra.mrb[28].mxu0 %v360_v21 }
  0x60   : > { %1322 = vmatpush1.bf16.msra.mxu0 %v2666_v23 }
  0x61   : > { %791 = vmatmul.mubr.bf16.gmra.mrb[28].mxu1 %v360_v21  ;;  %1323 = vmatprep.subr.bf16.mxu0 %v2671_v24  ;;  %v2683_v24 = vld [vmem:[%s3725_s3 + $0x134] ss:$8 sps:$4 sm:$0xff]  }
  0x64   : > { %1324 = vmatpush1.bf16.msra.mxu0 %v2669_v25 }
  0x65   : > { %1406 = vmatprep.subr.bf16.mxu0 %v2674_v2 }
  0xfa   : > { %v609_v33 = vpop.f32.mrb[0].mxu0 }
  0xfb   : > { %v610_v34 = vadd.f32 %v609_v33, %v3122_v31  ;;  %v611_v35 = vpop.f32.mrb[1].mxu0 }
  0xfc   : > { %v612_v36 = vadd.f32 %v611_v35, %v3126_v32  ;;  %v613_v37 = vpop.f32.mrb[2].mxu0  ;;  %v722_v11 = vpop.f32.mrb[0].mxu1 }
  0xfd   : > { %v614_v38 = vadd.f32 %v613_v37, %v3122_v31  ;;  %v615_v39 = vpop.f32.mrb[3].mxu0  ;;  %v801_v44 = vmax.f32 %v610_v34, 0.0  ;;  %v723_v14 = vadd.f32 %v722_v11, %v3161_v0  ;;  %v724_v15 = vpop.f32.mrb[1].mxu1  ;;  %v2729_v37 = vld [vmem:[%s3727_s5 + $0x20] sm:$0xff]  }
  0xfe   : > { %v616_v43 = vadd.f32 %v615_v39, %v3126_v32  ;;  %v802_v46 = vmax.f32 %v612_v36, 0.0  ;;  %v725_v20 = vadd.f32 %v724_v15, %v3170_v5  ;;  %v726_v21 = vpop.f32.mrb[2].mxu1  ;;  %2400 = vmatpush3.bf16.msra.mxu1 %v2729_v37  ;;  %v2690_v37 = vld [vmem:[%s3725_s3 + $0x160] ss:$8 sps:$4 sm:$0xff]  }
  0xff   : > { %v805_v45 = vmax.f32 %v614_v38, 0.0  ;;  %v803_v25 = vmax.f32 %v723_v14, 0.0  ;;  %v727_v2 = vadd.f32 %v726_v21, %v3161_v0  ;;  %v728_v29 = vpop.f32.mrb[3].mxu1  ;;  %2401 = vmatprep.subr.bf16.mxu1 %v2730_v41  ;;  %v2692_v21 = vld [vmem:[%s3725_s3 + $0x164] ss:$8 sps:$4 sm:$0xff]  }
 0x100   : > { %v806_v47 = vmax.f32 %v616_v43, 0.0  ;;  %v804_v35 = vmax.f32 %v725_v20, 0.0  ;;  %v729_v36 = vadd.f32 %v728_v29, %v3170_v5  ;;  %v2681_v43 = vld [vmem:[%s3725_s3 + $0x130] ss:$8 sps:$4 sm:$0xff]  }
 0x101   : > { %v865_v49 = vpack.c.bf16 %v805_v45, %v801_v44  ;;  %v807_v40 = vmax.f32 %v727_v2, 0.0 }
 0x102   : > { %v866_v52 = vpack.c.bf16 %v806_v47, %v802_v46  ;;  %v619_v53 = vpop.f32.mrb[4].mxu0  ;;  %v808_v44 = vmax.f32 %v729_v36, 0.0  ;;  %v2686_v47 = vld [vmem:[%s3725_s3 + $0x144] ss:$8 sps:$4 sm:$0xff]  }
 0x103   : > { %v620_v56 = vadd.f32 %v619_v53, %v3122_v31  ;;  %v621_v57 = vpop.f32.mrb[5].mxu0  ;;  %v3207_v48 = vpack.c.bf16 %v807_v40, %v803_v25  ;;  %v2731_v53 = vld [vmem:[%s3727_s5 + $0x28] sm:$0xff]  }
 0x104   : > { %v622_v59 = vadd.f32 %v621_v57, %v3126_v32  ;;  %v623_v60 = vpop.f32.mrb[6].mxu0  ;;  %1325 = vmatprep.mubr.bf16.mxu0 %v866_v52  ;;  %v3209_v51 = vpack.c.bf16 %v808_v44, %v804_v35  ;;  %v732_v52 = vpop.f32.mrb[4].mxu1  ;;  %v2732_v57 = vld [vmem:[%s3727_s5 + $0x70] sm:$0xff]   ;;  %2402 = vmatpush3.bf16.msra.mxu1 %v2731_v53 }
 0x105   : > { %v624_v62 = vadd.f32 %v623_v60, %v3122_v31  ;;  %v625_v63 = vpop.f32.mrb[7].mxu0  ;;  %1326 = vmatmul.mubr.bf16.vlgmr.msra.gmra.mrb[32].mxu0 %v865_v49  ;;  %v809_v6 = vmax.f32 %v620_v56, 0.0  ;;  %v733_v55 = vadd.f32 %v732_v52, %v3161_v0  ;;  %v734_v56 = vpop.f32.mrb[5].mxu1  ;;  %v2684_v60 = vld [vmem:[%s3725_s3 + $0x140] ss:$8 sps:$4 sm:$0xff]   ;;  %2403 = vmatprep.subr.bf16.mxu1 %v2732_v57 }
 0x106   : > { %v626_v3 = vadd.f32 %v625_v63, %v3126_v32  ;;  %1407 = vmatpush1.bf16.msra.mxu0 %v2672_v54  ;;  %v810_v9 = vmax.f32 %v622_v59, 0.0  ;;  %v735_v61 = vadd.f32 %v734_v56, %v3170_v5  ;;  %v2693_v56 = vld [vmem:[%s3725_s3 + $0x170] ss:$8 sps:$4 sm:$0xff]  }
 0x107   : > { %v813_v7 = vmax.f32 %v624_v62, 0.0  ;;  %1408 = vmatprep.subr.bf16.mxu0 %v2677_v58  ;;  %v736_v62 = vpop.f32.mrb[6].mxu1 }
 0x108   : > { %v814_v10 = vmax.f32 %v626_v3, 0.0  ;;  %v2689_v3 = vld [vmem:[%s3725_s3 + $0x154] ss:$8 sps:$4 sm:$0xff]   ;;  %2404 = vmatpush3.bf16.msra.mxu1 %v2733_v12 }
 0x109   : > { %v869_v13 = vpack.c.bf16 %v813_v7, %v809_v6  ;;  %v737_v6 = vadd.f32 %v736_v62, %v3161_v0  ;;  %v738_v7 = vpop.f32.mrb[7].mxu1 }
 0x10a   : > { %v870_v17 = vpack.c.bf16 %v814_v10, %v810_v9  ;;  %1409 = vmatpush1.bf16.msra.mxu0 %v2675_v4  ;;  %v629_v18 = vpop.f32.mrb[8].mxu0  ;;  %v811_v4 = vmax.f32 %v733_v55, 0.0  ;;  %v812_v10 = vmax.f32 %v735_v61, 0.0  ;;  %v739_v11 = vadd.f32 %v738_v7, %v3170_v5 }
 0x10b   : > { %v630_v22 = vadd.f32 %v629_v18, %v3122_v31  ;;  %v631_v23 = vpop.f32.mrb[9].mxu0  ;;  %1410 = vmatprep.subr.bf16.mxu0 %v2680_v8  ;;  %v815_v15 = vmax.f32 %v737_v6, 0.0 }
 0x10c   : > { %v632_v33 = vadd.f32 %v631_v23, %v3126_v32  ;;  %v633_v34 = vpop.f32.mrb[10].mxu0  ;;  %1335 = vmatprep.mubr.bf16.mxu0 %v870_v17  ;;  %v2687_v17 = vld [vmem:[%s3725_s3 + $0x150] ss:$8 sps:$4 sm:$0xff]   ;;  %v816_v18 = vmax.f32 %v739_v11, 0.0  ;;  %v742_v2 = vpop.f32.mrb[8].mxu1 }
 0x10d   : > { %v634_v38 = vadd.f32 %v633_v34, %v3122_v31  ;;  %v635_v39 = vpop.f32.mrb[11].mxu0  ;;  %1336 = vmatmul.mubr.bf16.gmra.mrb[36].mxu0 %v869_v13  ;;  %v817_v45 = vmax.f32 %v630_v22, 0.0  ;;  %v3240_v22 = vpack.c.bf16 %v815_v15, %v811_v4  ;;  %v744_v34 = vpop.f32.mrb[9].mxu1  ;;  %v2701_v15 = vld [vmem:[%s3725_s3 + $0x194] ss:$8 sps:$4 sm:$0xff]  }
 0x10e   : > { %v636_v42 = vadd.f32 %v635_v39, %v3126_v32  ;;  %1411 = vmatpush1.bf16.msra.mxu0 %v2678_v19  ;;  %v818_v49 = vmax.f32 %v632_v33, 0.0  ;;  %v3242_v25 = vpack.c.bf16 %v816_v18, %v812_v10  ;;  %v743_v33 = vadd.f32 %v742_v2, %v3161_v0  ;;  %v746_v39 = vpop.f32.mrb[10].mxu1  ;;  %v2696_v10 = vld [vmem:[%s3725_s3 + $0x180] ss:$8 sps:$4 sm:$0xff]  }
 0x10f   : > { %v821_v46 = vmax.f32 %v634_v38, 0.0  ;;  %1412 = vmatprep.subr.bf16.mxu0 %v2683_v24  ;;  %v745_v38 = vadd.f32 %v744_v34, %v3170_v5  ;;  %v747_v44 = vadd.f32 %v746_v39, %v3161_v0  ;;  %v2699_v34 = vld [vmem:[%s3725_s3 + $0x190] ss:$8 sps:$4 sm:$0xff]  }
 0x110   : > { %v822_v50 = vmax.f32 %v636_v42, 0.0  ;;  %v2695_v42 = vld [vmem:[%s3725_s3 + $0x174] ss:$8 sps:$4 sm:$0xff]  }
 0x111   : > { %v873_v54 = vpack.c.bf16 %v821_v46, %v817_v45  ;;  %v748_v45 = vpop.f32.mrb[11].mxu1 }
 0x112   : > { %v874_v58 = vpack.c.bf16 %v822_v50, %v818_v49  ;;  %1413 = vmatpush1.bf16.msra.mxu0 %v2681_v43  ;;  %v639_v59 = vpop.f32.mrb[12].mxu0  ;;  %v819_v43 = vmax.f32 %v743_v33, 0.0  ;;  %v820_v49 = vmax.f32 %v745_v38, 0.0  ;;  %v749_v50 = vadd.f32 %v748_v45, %v3170_v5  ;;  %v2704_v38 = vld [vmem:[%s3725_s3 + $0x1a4] ss:$8 sps:$4 sm:$0xff]  }
 0x113   : > { %v640_v63 = vadd.f32 %v639_v59, %v3122_v31  ;;  %v641_v1 = vpop.f32.mrb[13].mxu0  ;;  %1414 = vmatprep.subr.bf16.mxu0 %v2686_v47 }
 0x114   : > { %v642_v8 = vadd.f32 %v641_v1, %v3126_v32  ;;  %v643_v9 = vpop.f32.mrb[14].mxu0  ;;  %1345 = vmatprep.mubr.bf16.mxu0 %v874_v58  ;;  %v824_v57 = vmax.f32 %v749_v50, 0.0  ;;  %v2702_v50 = vld [vmem:[%s3725_s3 + $0x1a0] ss:$8 sps:$4 sm:$0xff]  }
 0x115   : > { %v644_v13 = vadd.f32 %v643_v9, %v3122_v31  ;;  %v645_v14 = vpop.f32.mrb[15].mxu0  ;;  %1346 = vmatmul.mubr.bf16.gmra.mrb[40].mxu0 %v873_v54  ;;  %v825_v19 = vmax.f32 %v640_v63, 0.0  ;;  %v823_v54 = vmax.f32 %v747_v44, 0.0 }
 0x116   : > { %v646_v16 = vadd.f32 %v645_v14, %v3126_v32  ;;  %1415 = vmatpush1.bf16.msra.mxu0 %v2684_v60  ;;  %v826_v23 = vmax.f32 %v642_v8, 0.0  ;;  %v2698_v60 = vld [vmem:[%s3725_s3 + $0x184] ss:$8 sps:$4 sm:$0xff]   ;;  %v3266_v1 = vpack.c.bf16 %v824_v57, %v820_v49 }
 0x117   : > { %v829_v20 = vmax.f32 %v644_v13, 0.0  ;;  %1416 = vmatprep.subr.bf16.mxu0 %v2689_v3  ;;  %v3264_v61 = vpack.c.bf16 %v823_v54, %v819_v43  ;;  %v752_v3 = vpop.f32.mrb[12].mxu1 }
 0x118   : > { %v830_v24 = vmax.f32 %v646_v16, 0.0  ;;  %v753_v6 = vadd.f32 %v752_v3, %v3161_v0  ;;  %v754_v7 = vpop.f32.mrb[13].mxu1 }
 0x119   : > { %v877_v29 = vpack.c.bf16 %v829_v20, %v825_v19  ;;  %v755_v11 = vadd.f32 %v754_v7, %v3170_v5  ;;  %v756_v12 = vpop.f32.mrb[14].mxu1 }
 0x11a   : > { %v878_v35 = vpack.c.bf16 %v830_v24, %v826_v23  ;;  %1417 = vmatpush1.bf16.msra.mxu0 %v2687_v17  ;;  %v649_v36 = vpop.f32.mrb[16].mxu0  ;;  %v827_v16 = vmax.f32 %v753_v6, 0.0  ;;  %v757_v17 = vadd.f32 %v756_v12, %v3161_v0  ;;  %v758_v18 = vpop.f32.mrb[15].mxu1 }
 0x11b   : > { %v650_v40 = vadd.f32 %v649_v36, %v3122_v31  ;;  %v651_v41 = vpop.f32.mrb[17].mxu0  ;;  %1418 = vmatprep.subr.bf16.mxu0 %v2692_v21  ;;  %v828_v21 = vmax.f32 %v755_v11, 0.0  ;;  %v759_v23 = vadd.f32 %v758_v18, %v3170_v5 }
 0x11c   : > { %v652_v46 = vadd.f32 %v651_v41, %v3126_v32  ;;  %v653_v47 = vpop.f32.mrb[18].mxu0  ;;  %1355 = vmatprep.mubr.bf16.mxu0 %v878_v35  ;;  %v762_v43 = vpop.f32.mrb[16].mxu1 }
 0x11d   : > { %v654_v52 = vadd.f32 %v653_v47, %v3122_v31  ;;  %v655_v53 = vpop.f32.mrb[19].mxu0  ;;  %1356 = vmatmul.mubr.bf16.gmra.mrb[44].mxu0 %v877_v29  ;;  %v833_v58 = vmax.f32 %v650_v40, 0.0  ;;  %v831_v29 = vmax.f32 %v757_v17, 0.0  ;;  %v832_v35 = vmax.f32 %v759_v23, 0.0 }
 0x11e   : > { %v656_v55 = vadd.f32 %v655_v53, %v3126_v32  ;;  %1419 = vmatpush1.bf16.msra.mxu0 %v2690_v37  ;;  %v834_v62 = vmax.f32 %v652_v46, 0.0  ;;  %v763_v45 = vadd.f32 %v762_v43, %v3161_v0  ;;  %v764_v46 = vpop.f32.mrb[17].mxu1 }
 0x11f   : > { %v837_v59 = vmax.f32 %v654_v52, 0.0  ;;  %1420 = vmatprep.subr.bf16.mxu0 %v2695_v42  ;;  %v3288_v39 = vpack.c.bf16 %v831_v29, %v827_v16  ;;  %v3290_v42 = vpack.c.bf16 %v832_v35, %v828_v21  ;;  %v765_v52 = vadd.f32 %v764_v46, %v3170_v5  ;;  %v766_v53 = vpop.f32.mrb[18].mxu1 }
 0x120   : > { %v838_v63 = vmax.f32 %v656_v55, 0.0  ;;  %v835_v57 = vmax.f32 %v763_v45, 0.0 }
 0x121   : > { %v881_v4 = vpack.c.bf16 %v837_v59, %v833_v58  ;;  %v767_v58 = vadd.f32 %v766_v53, %v3161_v0  ;;  %v768_v59 = vpop.f32.mrb[19].mxu1 }
 0x122   : > { %v882_v8 = vpack.c.bf16 %v838_v63, %v834_v62  ;;  %1421 = vmatpush1.bf16.msra.mxu0 %v2693_v56  ;;  %v659_v9 = vpop.f32.mrb[20].mxu0  ;;  %v2707_v56 = vld [vmem:[%s3725_s3 + $0x1b4] ss:$8 sps:$4 sm:$0xff]   ;;  %v836_v63 = vmax.f32 %v765_v52, 0.0  ;;  %v769_v3 = vadd.f32 %v768_v59, %v3170_v5  ;;  %v2711_v52 = vld [vmem:[%s3725_s3 + $0x1d0] ss:$8 sps:$4 sm:$0xff]  }
 0x123   : > { %v660_v13 = vadd.f32 %v659_v9, %v3122_v31  ;;  %v661_v14 = vpop.f32.mrb[21].mxu0  ;;  %1422 = vmatprep.subr.bf16.mxu0 %v2698_v60  ;;  %v839_v7 = vmax.f32 %v767_v58, 0.0  ;;  %v2705_v9 = vld [vmem:[%s3725_s3 + $0x1b0] ss:$8 sps:$4 sm:$0xff]  }
 0x124   : > { %v662_v19 = vadd.f32 %v661_v14, %v3126_v32  ;;  %v663_v20 = vpop.f32.mrb[22].mxu0  ;;  %1365 = vmatprep.mubr.bf16.mxu0 %v882_v8  ;;  %v772_v18 = vpop.f32.mrb[20].mxu1 }
 0x125   : > { %v664_v24 = vadd.f32 %v663_v20, %v3122_v31  ;;  %v665_v2 = vpop.f32.mrb[23].mxu0  ;;  %1366 = vmatmul.mubr.bf16.gmra.mrb[48].mxu0 %v881_v4  ;;  %v841_v36 = vmax.f32 %v660_v13, 0.0  ;;  %v2710_v13 = vld [vmem:[%s3725_s3 + $0x1c4] ss:$8 sps:$4 sm:$0xff]   ;;  %v3312_v14 = vpack.c.bf16 %v839_v7, %v835_v57  ;;  %v773_v20 = vadd.f32 %v772_v18, %v3161_v0  ;;  %v774_v21 = vpop.f32.mrb[21].mxu1 }
 0x126   : > { %v666_v33 = vadd.f32 %v665_v2, %v3126_v32  ;;  %1423 = vmatpush1.bf16.msra.mxu0 %v2696_v10  ;;  %v842_v40 = vmax.f32 %v662_v19, 0.0  ;;  %v840_v10 = vmax.f32 %v769_v3, 0.0  ;;  %v2708_v2 = vld [vmem:[%s3725_s3 + $0x1c0] ss:$8 sps:$4 sm:$0xff]   ;;  %v775_v29 = vadd.f32 %v774_v21, %v3170_v5 }
 0x127   : > { %v845_v37 = vmax.f32 %v664_v24, 0.0  ;;  %1424 = vmatprep.subr.bf16.mxu0 %v2701_v15 }
 0x128   : > { %v846_v41 = vmax.f32 %v666_v33, 0.0  ;;  %v3314_v17 = vpack.c.bf16 %v840_v10, %v836_v63  ;;  %v776_v33 = vpop.f32.mrb[22].mxu1 }
 0x129   : > { %v885_v44 = vpack.c.bf16 %v845_v37, %v841_v36  ;;  %v2713_v36 = vld [vmem:[%s3725_s3 + $0x1d4] ss:$8 sps:$4 sm:$0xff]   ;;  %v843_v37 = vmax.f32 %v773_v20, 0.0 }
 0x12a   : > { %v886_v47 = vpack.c.bf16 %v846_v41, %v842_v40  ;;  %1425 = vmatpush1.bf16.msra.mxu0 %v2699_v34  ;;  %v669_v49 = vpop.f32.mrb[24].mxu0  ;;  %v778_v40 = vpop.f32.mrb[23].mxu1 }
 0x12b   : > { %v670_v54 = vadd.f32 %v669_v49, %v3122_v31  ;;  %v671_v55 = vpop.f32.mrb[25].mxu0  ;;  %1426 = vmatprep.subr.bf16.mxu0 %v2704_v38  ;;  %v777_v38 = vadd.f32 %v776_v33, %v3161_v0  ;;  %v779_v45 = vadd.f32 %v778_v40, %v3170_v5 }
 0x12c   : > { %v672_v60 = vadd.f32 %v671_v55, %v3126_v32  ;;  %v673_v62 = vpop.f32.mrb[26].mxu0  ;;  %1375 = vmatprep.mubr.bf16.mxu0 %v886_v47 }
 0x12d   : > { %v674_v4 = vadd.f32 %v673_v62, %v3122_v31  ;;  %v675_v6 = vpop.f32.mrb[27].mxu0  ;;  %1376 = vmatmul.mubr.bf16.gmra.mrb[52].mxu0 %v885_v44  ;;  %v849_v11 = vmax.f32 %v670_v54, 0.0  ;;  %v844_v44 = vmax.f32 %v775_v29, 0.0  ;;  %v847_v49 = vmax.f32 %v777_v38, 0.0 }
 0x12e   : > { %v676_v8 = vadd.f32 %v675_v6, %v3126_v32  ;;  %1427 = vmatpush1.bf16.msra.mxu0 %v2702_v50  ;;  %v850_v15 = vmax.f32 %v672_v60, 0.0  ;;  %v848_v53 = vmax.f32 %v779_v45, 0.0  ;;  %v782_v60 = vpop.f32.mrb[24].mxu1 }
 0x12f   : > { %v853_v12 = vmax.f32 %v674_v4, 0.0  ;;  %1428 = vmatprep.subr.bf16.mxu0 %v2707_v56  ;;  %v2716_v56 = vld [vmem:[%s3725_s3 + $0x1e4] ss:$8 sps:$4 sm:$0xff]   ;;  %v887_v57 = vpack.c.bf16 %v847_v49, %v843_v37  ;;  %v784_v63 = vpop.f32.mrb[25].mxu1  ;;  %v2714_v4 = vld [vmem:[%s3725_s3 + $0x1e0] ss:$8 sps:$4 sm:$0xff]  }
 0x130   : > { %v854_v16 = vmax.f32 %v676_v8, 0.0  ;;  %v888_v59 = vpack.c.bf16 %v848_v53, %v844_v44  ;;  %v785_v6 = vadd.f32 %v784_v63, %v3170_v5  ;;  %v786_v7 = vpop.f32.mrb[26].mxu1  ;;  %v2719_v8 = vld [vmem:[%s3725_s3 + $0x1f4] ss:$8 sps:$4 sm:$0xff]  }
 0x131   : > { %v889_v19 = vpack.c.bf16 %v853_v12, %v849_v11  ;;  %v787_v10 = vadd.f32 %v786_v7, %v3161_v0  ;;  %v788_v11 = vpop.f32.mrb[27].mxu1 }
 0x132   : > { %v890_v23 = vpack.c.bf16 %v854_v16, %v850_v15  ;;  %1429 = vmatpush1.bf16.msra.mxu0 %v2705_v9  ;;  %v679_v24 = vpop.f32.mrb[28].mxu0  ;;  %v852_v12 = vmax.f32 %v785_v6, 0.0  ;;  %v2717_v16 = vld [vmem:[%s3725_s3 + $0x1f0] ss:$8 sps:$4 sm:$0xff]  }
 0x133   : > { %v680_v34 = vadd.f32 %v679_v24, %v3122_v31  ;;  %v681_v35 = vpop.f32.mrb[29].mxu0  ;;  %1430 = vmatprep.subr.bf16.mxu0 %v2710_v13  ;;  %v789_v13 = vadd.f32 %v788_v11, %v3170_v5  ;;  %v855_v15 = vmax.f32 %v787_v10, 0.0 }
 0x134   : > { %v682_v41 = vadd.f32 %v681_v35, %v3126_v32  ;;  %v683_v43 = vpop.f32.mrb[30].mxu0  ;;  %1385 = vmatprep.mubr.bf16.mxu0 %v890_v23  ;;  %v792_v21 = vpop.f32.mrb[28].mxu1 }
 0x135   : > { %v684_v46 = vadd.f32 %v683_v43, %v3122_v31  ;;  %v685_v47 = vpop.f32.mrb[31].mxu0  ;;  %1386 = vmatmul.mubr.bf16.gmra.mrb[56].mxu0 %v889_v19  ;;  %v857_v54 = vmax.f32 %v680_v34, 0.0  ;;  %v856_v18 = vmax.f32 %v789_v13, 0.0  ;;  %v793_v23 = vadd.f32 %v792_v21, %v3161_v0  ;;  %v794_v24 = vpop.f32.mrb[29].mxu1 }
 0x136   : > { %v686_v50 = vadd.f32 %v685_v47, %v3126_v32  ;;  %1431 = vmatpush1.bf16.msra.mxu0 %v2708_v2  ;;  %v858_v31 = vmax.f32 %v682_v41, 0.0  ;;  %v783_v32 = vadd.f32 %v782_v60, %v3161_v0  ;;  %v795_v2 = vadd.f32 %v794_v24, %v3170_v5  ;;  %v796_v29 = vpop.f32.mrb[30].mxu1 }
 0x137   : > { %v861_v55 = vmax.f32 %v684_v46, 0.0  ;;  %1432 = vmatprep.subr.bf16.mxu0 %v2713_v36  ;;  %v892_v20 = vpack.c.bf16 %v856_v18, %v852_v12  ;;  %v859_v33 = vmax.f32 %v793_v23, 0.0  ;;  %v797_v34 = vadd.f32 %v796_v29, %v3161_v0  ;;  %v798_v35 = vpop.f32.mrb[31].mxu1  ;;  %v2734_v0 = vld [vmem:[%s3727_s5 + $0x78] sm:$0xff]  }
 0x138   : > { %v862_v58 = vmax.f32 %v686_v50, 0.0  ;;  %v851_v9 = vmax.f32 %v783_v32, 0.0  ;;  %v860_v36 = vmax.f32 %v795_v2, 0.0  ;;  %v799_v37 = vadd.f32 %v798_v35, %v3170_v5  ;;  %v2735_v5 = vld [vmem:[%s3727_s5 + $0x38] sm:$0xff]   ;;  %2405 = vmatprep.subr.bf16.mxu1 %v2734_v0 }
 0x139   : > { %v893_v62 = vpack.c.bf16 %v861_v55, %v857_v54  ;;  %2406 = vmatpush3.bf16.msra.mxu1 %v2735_v5  ;;  %v2737_v54 = vld [vmem:[%s3729_s7 + $0x8] sm:$0xff]  }
 0x13a   : > { %v894_v3 = vpack.c.bf16 %v862_v58, %v858_v31  ;;  %1433 = vmatpush1.bf16.msra.mxu0 %v2711_v52  ;;  %v891_v19 = vpack.c.bf16 %v855_v15, %v851_v9  ;;  %v864_v38 = vmax.f32 %v799_v37, 0.0 }
 0x13b   : > { %1434 = vmatprep.subr.bf16.mxu0 %v2716_v56 }
 0x13c   : > { %1395 = vmatprep.mubr.bf16.mxu0 %v894_v3  ;;  %v896_v41 = vpack.c.bf16 %v864_v38, %v860_v36 }
 0x13d   : > { %1396 = vmatmul.mubr.bf16.gmra.mrb[60].mxu0 %v893_v62  ;;  %v2738_v62 = vld [vmem:[%s3729_s7 + $0x10] sm:$0xff]  }
 0x13e   : > { %1435 = vmatpush1.bf16.msra.mxu0 %v2714_v4  ;;  %1438 = vmatprep.mubr.bf16.mxu0 %v3209_v51  ;;  %v863_v51 = vmax.f32 %v797_v34, 0.0 }
 0x13f   : > { %1436 = vmatprep.subr.bf16.mxu0 %v2719_v8 }
 0x140   : > { %v895_v40 = vpack.c.bf16 %v863_v51, %v859_v33 }
 0x142   : > { %1437 = vmatpush1.bf16.msra.mxu0 %v2717_v16 }
 0x145   : > { %1439 = vmatmul.mubr.bf16.vlgmr.msra.gmra.mrb[32].mxu0 %v3207_v48  ;;  %v2736_v48 = vld [vmem:[%s3729_s7] sm:$0xff]  }
 0x146   : > { %1448 = vmatprep.mubr.bf16.mxu0 %v3242_v25  ;;  %2471 = vmatprep.subr.bf16.mxu1 %v2736_v48 }
 0x14d   : > { %1449 = vmatmul.mubr.bf16.gmra.mrb[36].mxu0 %v3240_v22  ;;  %v961_v22 = vld [vmem:[%s3726_s4] sm:$0x3] }
 0x14e   : > { %1458 = vmatprep.mubr.bf16.mxu0 %v3266_v1  ;;  %v3377_v25 = vrot.slane %v961_v22, %v397_v28 }
 0x155   : > { %1459 = vmatmul.mubr.bf16.gmra.mrb[40].mxu0 %v3264_v61  ;;  %v3381_v61 = vrot.slane %v961_v22, %v401_v30 }
 0x156   : > { %1468 = vmatprep.mubr.bf16.mxu0 %v3290_v42 }
 0x15d   : > { %1469 = vmatmul.mubr.bf16.gmra.mrb[44].mxu0 %v3288_v39 }
 0x15e   : > { %1478 = vmatprep.mubr.bf16.mxu0 %v3314_v17 }
 0x165   : > { %1479 = vmatmul.mubr.bf16.gmra.mrb[48].mxu0 %v3312_v14 }
 0x166   : > { %1488 = vmatprep.mubr.bf16.mxu0 %v888_v59 }
 0x16d   : > { %1489 = vmatmul.mubr.bf16.gmra.mrb[52].mxu0 %v887_v57 }
 0x16e   : > { %1498 = vmatprep.mubr.bf16.mxu0 %v892_v20 }
 0x175   : > { %1499 = vmatmul.mubr.bf16.gmra.mrb[56].mxu0 %v891_v19 }
 0x176   : > { %1508 = vmatprep.mubr.bf16.mxu0 %v896_v41 }
 0x17d   : > { %1509 = vmatmul.mubr.bf16.gmra.mrb[60].mxu0 %v895_v40 }
 0x218   : > { %v1440_v1 = vpop.f32.mrb[32].mxu0 }
 0x219   : > { %v2503_v39 = vadd.f32 %v1440_v1, %v3377_v25  ;;  %v1442_v42 = vpop.f32.mrb[33].mxu0 }
 0x21a   : > { %v2504_v14 = vadd.f32 %v1442_v42, %v3381_v61  ;;  %v1444_v17 = vpop.f32.mrb[34].mxu0 }
 0x21b   : > { %v2505_v43 = vadd.f32 %v1444_v17, %v3377_v25  ;;  %v1446_v44 = vpop.f32.mrb[35].mxu0  ;;  %v1519_v46 = vmax.f32 %v2503_v39, 0.0 }
 0x21c   : > { %v2506_v45 = vadd.f32 %v1446_v44, %v3381_v61  ;;  %v1520_v28 = vmax.f32 %v2504_v14, 0.0 }
 0x21d   : > { %v1521_v47 = vmax.f32 %v2505_v43, 0.0 }
 0x21e   : > { %v1522_v49 = vmax.f32 %v2506_v45, 0.0 }
 0x21f   : > { %v1551_v50 = vpack.c.bf16 %v1521_v47, %v1519_v46 }
 0x220   : > { %v1552_v27 = vpack.c.bf16 %v1522_v49, %v1520_v28  ;;  %v1450_v30 = vpop.f32.mrb[36].mxu0 }
 0x221   : > { %v2507_v52 = vadd.f32 %v1450_v30, %v3377_v25  ;;  %v1452_v53 = vpop.f32.mrb[37].mxu0 }
 0x222   : > { %v2508_v55 = vadd.f32 %v1452_v53, %v3381_v61  ;;  %v1454_v56 = vpop.f32.mrb[38].mxu0  ;;  %1734 = vmatprep.mubr.bf16.mxu1 %v1552_v27 }
 0x223   : > { %v2509_v57 = vadd.f32 %v1454_v56, %v3377_v25  ;;  %v1456_v31 = vpop.f32.mrb[39].mxu0  ;;  %1735 = vmatmul.mubr.bf16.vlgmr.msra.gmra.mrb[32].mxu1 %v1551_v50  ;;  %v1523_v59 = vmax.f32 %v2507_v52, 0.0 }
 0x224   : > { %v2510_v58 = vadd.f32 %v1456_v31, %v3381_v61  ;;  %2472 = vmatpush3.bf16.msra.mxu1 %v2736_v48  ;;  %v1524_v32 = vmax.f32 %v2508_v55, 0.0 }
 0x225   : > { %v1525_v60 = vmax.f32 %v2509_v57, 0.0  ;;  %2473 = vmatprep.subr.bf16.mxu1 %v2737_v54 }
 0x226   : > { %v1526_v63 = vmax.f32 %v2510_v58, 0.0 }
 0x227   : > { %v1553_v3 = vpack.c.bf16 %v1525_v60, %v1523_v59 }
 0x228   : > { %v1554_v4 = vpack.c.bf16 %v1526_v63, %v1524_v32  ;;  %v1460_v6 = vpop.f32.mrb[40].mxu0  ;;  %2474 = vmatpush3.bf16.msra.mxu1 %v2737_v54 }
 0x229   : > { %v2511_v7 = vadd.f32 %v1460_v6, %v3377_v25  ;;  %v1462_v8 = vpop.f32.mrb[41].mxu0  ;;  %2475 = vmatprep.subr.bf16.mxu1 %v2738_v62 }
 0x22a   : > { %v2512_v9 = vadd.f32 %v1462_v8, %v3381_v61  ;;  %v1464_v10 = vpop.f32.mrb[42].mxu0  ;;  %1742 = vmatprep.mubr.bf16.mxu1 %v1554_v4 }
 0x22b   : > { %v2513_v11 = vadd.f32 %v1464_v10, %v3377_v25  ;;  %v1466_v12 = vpop.f32.mrb[43].mxu0  ;;  %1743 = vmatmul.mubr.bf16.gmra.mrb[36].mxu1 %v1553_v3  ;;  %v1527_v15 = vmax.f32 %v2511_v7, 0.0 }
 0x22c   : > { %v2514_v13 = vadd.f32 %v1466_v12, %v3381_v61  ;;  %2476 = vmatpush3.bf16.msra.mxu1 %v2738_v62  ;;  %v1528_v18 = vmax.f32 %v2512_v9, 0.0 }
 0x22d   : > { %v1529_v16 = vmax.f32 %v2513_v11, 0.0 }
 0x22e   : > { %v1530_v19 = vmax.f32 %v2514_v13, 0.0 }
 0x22f   : > { %v1555_v20 = vpack.c.bf16 %v1529_v16, %v1527_v15 }
 0x230   : > { %v1556_v21 = vpack.c.bf16 %v1530_v19, %v1528_v18  ;;  %v1470_v23 = vpop.f32.mrb[44].mxu0 }
 0x231   : > { %v2515_v24 = vadd.f32 %v1470_v23, %v3377_v25  ;;  %v1472_v2 = vpop.f32.mrb[45].mxu0 }
 0x232   : > { %v2516_v29 = vadd.f32 %v1472_v2, %v3381_v61  ;;  %v1474_v33 = vpop.f32.mrb[46].mxu0  ;;  %1750 = vmatprep.mubr.bf16.mxu1 %v1556_v21 }
 0x233   : > { %v2517_v34 = vadd.f32 %v1474_v33, %v3377_v25  ;;  %v1476_v35 = vpop.f32.mrb[47].mxu0  ;;  %1751 = vmatmul.mubr.bf16.gmra.mrb[40].mxu1 %v1555_v20  ;;  %v1531_v37 = vmax.f32 %v2515_v24, 0.0 }
 0x234   : > { %v2518_v36 = vadd.f32 %v1476_v35, %v3381_v61  ;;  %v1532_v38 = vmax.f32 %v2516_v29, 0.0 }
 0x235   : > { %v1533_v51 = vmax.f32 %v2517_v34, 0.0 }
 0x236   : > { %v1534_v40 = vmax.f32 %v2518_v36, 0.0 }
 0x237   : > { %v1557_v41 = vpack.c.bf16 %v1533_v51, %v1531_v37  ;;  %v2739_v51 = vld [vmem:[%s3729_s7 + $0x18] sm:$0xff]  }
 0x238   : > { %v1558_v0 = vpack.c.bf16 %v1534_v40, %v1532_v38  ;;  %v1480_v5 = vpop.f32.mrb[48].mxu0  ;;  %2477 = vmatprep.subr.bf16.mxu1 %v2739_v51  ;;  %v2742_v38 = vld [vmem:[%s3729_s7 + $0x30] sm:$0xff]   ;;  %v2743_v40 = vld [vmem:[%s3729_s7 + $0x38] sm:$0xff]  }
 0x239   : > { %v2519_v48 = vadd.f32 %v1480_v5, %v3377_v25  ;;  %v1482_v22 = vpop.f32.mrb[49].mxu0  ;;  %2478 = vmatpush3.bf16.msra.mxu1 %v2739_v51 }
 0x23a   : > { %v2520_v1 = vadd.f32 %v1482_v22, %v3381_v61  ;;  %v1484_v39 = vpop.f32.mrb[50].mxu0  ;;  %1758 = vmatprep.mubr.bf16.mxu1 %v1558_v0  ;;  %v3439_v0 = vld [vmem:[%s3728_s6] ss:$0 sm:$0xff] }
 0x23b   : > { %v2521_v42 = vadd.f32 %v1484_v39, %v3377_v25  ;;  %v1486_v14 = vpop.f32.mrb[51].mxu0  ;;  %1759 = vmatmul.mubr.bf16.gmra.mrb[44].mxu1 %v1557_v41  ;;  %v1535_v43 = vmax.f32 %v2519_v48, 0.0 }
 0x23c   : > { %v2522_v17 = vadd.f32 %v1486_v14, %v3381_v61  ;;  %v1536_v45 = vmax.f32 %v2520_v1, 0.0 }
 0x23d   : > { %v1537_v44 = vmax.f32 %v2521_v42, 0.0 }
 0x23e   : > { %v1538_v46 = vmax.f32 %v2522_v17, 0.0 }
 0x23f   : > { %v1559_v47 = vpack.c.bf16 %v1537_v44, %v1535_v43 }
 0x240   : > { %v1560_v28 = vpack.c.bf16 %v1538_v46, %v1536_v45  ;;  %v1490_v49 = vpop.f32.mrb[52].mxu0 }
 0x241   : > { %v2523_v50 = vadd.f32 %v1490_v49, %v3377_v25  ;;  %v1492_v27 = vpop.f32.mrb[53].mxu0 }
 0x242   : > { %v2524_v30 = vadd.f32 %v1492_v27, %v3381_v61  ;;  %v1494_v52 = vpop.f32.mrb[54].mxu0  ;;  %1766 = vmatprep.mubr.bf16.mxu1 %v1560_v28 }
 0x243   : > { %v2525_v53 = vadd.f32 %v1494_v52, %v3377_v25  ;;  %v1496_v54 = vpop.f32.mrb[55].mxu0  ;;  %1767 = vmatmul.mubr.bf16.gmra.mrb[48].mxu1 %v1559_v47  ;;  %v1539_v56 = vmax.f32 %v2523_v50, 0.0 }
 0x244   : > { %v2526_v55 = vadd.f32 %v1496_v54, %v3381_v61  ;;  %v1540_v31 = vmax.f32 %v2524_v30, 0.0 }
 0x245   : > { %v1541_v57 = vmax.f32 %v2525_v53, 0.0 }
 0x246   : > { %v1542_v58 = vmax.f32 %v2526_v55, 0.0 }
 0x247   : > { %v1561_v59 = vpack.c.bf16 %v1541_v57, %v1539_v56 }
 0x248   : > { %v1562_v60 = vpack.c.bf16 %v1542_v58, %v1540_v31  ;;  %v1500_v62 = vpop.f32.mrb[56].mxu0 }
 0x249   : > { %v2527_v32 = vadd.f32 %v1500_v62, %v3377_v25  ;;  %v1502_v63 = vpop.f32.mrb[57].mxu0 }
 0x24a   : > { %v2528_v3 = vadd.f32 %v1502_v63, %v3381_v61  ;;  %v1504_v4 = vpop.f32.mrb[58].mxu0  ;;  %1774 = vmatprep.mubr.bf16.mxu1 %v1562_v60 }
 0x24b   : > { %v2529_v6 = vadd.f32 %v1504_v4, %v3377_v25  ;;  %v1506_v7 = vpop.f32.mrb[59].mxu0  ;;  %1775 = vmatmul.mubr.bf16.gmra.mrb[52].mxu1 %v1561_v59  ;;  %v1543_v9 = vmax.f32 %v2527_v32, 0.0 }
 0x24c   : > { %v2530_v8 = vadd.f32 %v1506_v7, %v3381_v61  ;;  %v1544_v11 = vmax.f32 %v2528_v3, 0.0 }
 0x24d   : > { %v1545_v10 = vmax.f32 %v2529_v6, 0.0 }
 0x24e   : > { %v1546_v12 = vmax.f32 %v2530_v8, 0.0 }
 0x24f   : > { %v1563_v13 = vpack.c.bf16 %v1545_v10, %v1543_v9 }
 0x250   : > { %v1564_v15 = vpack.c.bf16 %v1546_v12, %v1544_v11  ;;  %v1510_v16 = vpop.f32.mrb[60].mxu0 }
 0x251   : > { %v2531_v18 = vadd.f32 %v1510_v16, %v3377_v25  ;;  %v1512_v19 = vpop.f32.mrb[61].mxu0 }
 0x252   : > { %v2532_v20 = vadd.f32 %v1512_v19, %v3381_v61  ;;  %v1514_v21 = vpop.f32.mrb[62].mxu0  ;;  %1782 = vmatprep.mubr.bf16.mxu1 %v1564_v15 }
 0x253   : > { %v2533_v23 = vadd.f32 %v1514_v21, %v3377_v25  ;;  %v1516_v24 = vpop.f32.mrb[63].mxu0  ;;  %1783 = vmatmul.mubr.bf16.gmra.mrb[56].mxu1 %v1563_v13  ;;  %v1547_v29 = vmax.f32 %v2531_v18, 0.0  ;;  %v2740_v25 = vld [vmem:[%s3729_s7 + $0x20] sm:$0xff]  }
 0x254   : > { %v2534_v2 = vadd.f32 %v1516_v24, %v3381_v61  ;;  %v1548_v34 = vmax.f32 %v2532_v20, 0.0  ;;  %2479 = vmatprep.subr.bf16.mxu1 %v2740_v25  ;;  %v2741_v61 = vld [vmem:[%s3729_s7 + $0x28] sm:$0xff]  }
 0x255   : > { %v1549_v33 = vmax.f32 %v2533_v23, 0.0  ;;  %2480 = vmatpush3.bf16.msra.mxu1 %v2740_v25 }
 0x256   : > { %v1550_v35 = vmax.f32 %v2534_v2, 0.0  ;;  %2481 = vmatprep.subr.bf16.mxu1 %v2741_v61 }
 0x257   : > { %v1565_v36 = vpack.c.bf16 %v1549_v33, %v1547_v29 }
 0x258   : > { %v1566_v37 = vpack.c.bf16 %v1550_v35, %v1548_v34 }
 0x259   : > { %2482 = vmatpush3.bf16.msra.mxu1 %v2741_v61 }
 0x25a   : > { %1790 = vmatprep.mubr.bf16.mxu1 %v1566_v37  ;;  %2483 = vmatprep.subr.bf16.mxu1 %v2742_v38 }
 0x25b   : > { %1791 = vmatmul.mubr.bf16.gmra.mrb[60].mxu1 %v1565_v36 }
 0x25d   : > { %2484 = vmatpush3.bf16.msra.mxu1 %v2742_v38 }
 0x25e   : > { %2485 = vmatprep.subr.bf16.mxu1 %v2743_v40 }
 0x261   : > { %2486 = vmatpush3.bf16.msra.mxu1 %v2743_v40 }
 0x2f6   : > { %v2407_v41 = vpop.f32.mrb[32].mxu1 }
 0x2f7   : > { %v2408_v5 = vpop.f32.mrb[33].mxu1 }
 0x2f8   : > { %v2409_v48 = vadd.f32 %v2408_v5, %v2407_v41  ;;  %v2410_v22 = vpop.f32.mrb[34].mxu1 }
 0x2f9   : > { %v2411_v1 = vpop.f32.mrb[35].mxu1 }
 0x2fa   : > { %v1737_v39 = vadd.f32 %v2409_v48, %v3439_v0  ;;  %v2412_v42 = vadd.f32 %v2411_v1, %v2410_v22 }
 0x2fc   : > { %v1740_v14 = vadd.f32 %v2412_v42, %v3439_v0  ;;  %v1799_v17 = vmax.f32 %v1737_v39, 0.0 }
 0x2fe   : > { %v1800_v43 = vmax.f32 %v1740_v14, 0.0  ;;  %v2413_v44 = vpop.f32.mrb[36].mxu1 }
 0x2ff   : > { %v2414_v45 = vpop.f32.mrb[37].mxu1 }
 0x300   : > { %v2415_v46 = vadd.f32 %v2414_v45, %v2413_v44  ;;  %v2416_v47 = vpop.f32.mrb[38].mxu1  ;;  %v1815_v28 = vpack.c.bf16 %v1800_v43, %v1799_v17 }
 0x301   : > { %v2417_v49 = vpop.f32.mrb[39].mxu1 }
 0x302   : > { %v1745_v50 = vadd.f32 %v2415_v46, %v3439_v0  ;;  %v2418_v27 = vadd.f32 %v2417_v49, %v2416_v47  ;;  %2487 = vmatprep.mubr.bf16.mxu1 %v1815_v28 }
 0x304   : > { %v1748_v30 = vadd.f32 %v2418_v27, %v3439_v0  ;;  %v1801_v52 = vmax.f32 %v1745_v50, 0.0 }
 0x306   : > { %v1802_v53 = vmax.f32 %v1748_v30, 0.0  ;;  %v2419_v54 = vpop.f32.mrb[40].mxu1 }
 0x307   : > { %v2420_v55 = vpop.f32.mrb[41].mxu1 }
 0x308   : > { %v1816_v56 = vpack.c.bf16 %v1802_v53, %v1801_v52  ;;  %v2421_v57 = vadd.f32 %v2420_v55, %v2419_v54  ;;  %v2422_v31 = vpop.f32.mrb[42].mxu1 }
 0x309   : > { %v2423_v58 = vpop.f32.mrb[43].mxu1 }
 0x30a   : > { %v1753_v59 = vadd.f32 %v2421_v57, %v3439_v0  ;;  %v2424_v60 = vadd.f32 %v2423_v58, %v2422_v31  ;;  %2488 = vmatmul.mubr.bf16.vlgmr.msra.gmra.mrb[64].mxu1 %v1816_v56  ;;  %v3458_v58 = vand.u32 127, %v395_v26 }
 0x30c   : > { %v1756_v62 = vadd.f32 %v2424_v60, %v3439_v0  ;;  %v1803_v32 = vmax.f32 %v1753_v59, 0.0  ;;  %v2380_v59 = vld [vmem:[%s3730_s8] ss:$0 sm:$0xff]  ;;  %vm1993_vm0 = vcmp.lt.s32.totalorder %v3458_v58, 8 }
 0x30e   : > { %v1804_v63 = vmax.f32 %v1756_v62, 0.0  ;;  %v2425_v3 = vpop.f32.mrb[44].mxu1 }
 0x30f   : > { %v2426_v4 = vpop.f32.mrb[45].mxu1 }
 0x310   : > { %v2427_v6 = vadd.f32 %v2426_v4, %v2425_v3  ;;  %v2428_v7 = vpop.f32.mrb[46].mxu1  ;;  %v1817_v8 = vpack.c.bf16 %v1804_v63, %v1803_v32 }
 0x311   : > { %v2429_v9 = vpop.f32.mrb[47].mxu1 }
 0x312   : > { %v1761_v10 = vadd.f32 %v2427_v6, %v3439_v0  ;;  %v2430_v11 = vadd.f32 %v2429_v9, %v2428_v7  ;;  %2491 = vmatprep.mubr.bf16.mxu1 %v1817_v8 }
 0x314   : > { %v1764_v12 = vadd.f32 %v2430_v11, %v3439_v0  ;;  %v1805_v13 = vmax.f32 %v1761_v10, 0.0 }
 0x316   : > { %v1806_v15 = vmax.f32 %v1764_v12, 0.0  ;;  %v2431_v16 = vpop.f32.mrb[48].mxu1 }
 0x317   : > { %v2432_v18 = vpop.f32.mrb[49].mxu1 }
 0x318   : > { %v2433_v19 = vadd.f32 %v2432_v18, %v2431_v16  ;;  %v2434_v20 = vpop.f32.mrb[50].mxu1  ;;  %v1818_v21 = vpack.c.bf16 %v1806_v15, %v1805_v13 }
 0x319   : > { %v2435_v23 = vpop.f32.mrb[51].mxu1 }
 0x31a   : > { %v1769_v24 = vadd.f32 %v2433_v19, %v3439_v0  ;;  %v2436_v2 = vadd.f32 %v2435_v23, %v2434_v20  ;;  %2492 = vmatmul.mubr.bf16.gmra.mrb[68].mxu1 %v1818_v21 }
 0x31c   : > { %v1772_v29 = vadd.f32 %v2436_v2, %v3439_v0  ;;  %v1807_v33 = vmax.f32 %v1769_v24, 0.0 }
 0x31e   : > { %v1808_v34 = vmax.f32 %v1772_v29, 0.0  ;;  %v2437_v35 = vpop.f32.mrb[52].mxu1 }
 0x31f   : > { %v2438_v36 = vpop.f32.mrb[53].mxu1 }
 0x320   : > { %v2439_v37 = vadd.f32 %v2438_v36, %v2437_v35  ;;  %v2440_v51 = vpop.f32.mrb[54].mxu1  ;;  %v1819_v25 = vpack.c.bf16 %v1808_v34, %v1807_v33 }
 0x321   : > { %v2441_v61 = vpop.f32.mrb[55].mxu1 }
 0x322   : > { %v1777_v38 = vadd.f32 %v2439_v37, %v3439_v0  ;;  %v2442_v40 = vadd.f32 %v2441_v61, %v2440_v51  ;;  %2495 = vmatprep.mubr.bf16.mxu1 %v1819_v25 }
 0x324   : > { %v1780_v41 = vadd.f32 %v2442_v40, %v3439_v0  ;;  %v1809_v5 = vmax.f32 %v1777_v38, 0.0 }
 0x326   : > { %v1810_v48 = vmax.f32 %v1780_v41, 0.0  ;;  %v2443_v22 = vpop.f32.mrb[56].mxu1 }
 0x327   : > { %v2444_v1 = vpop.f32.mrb[57].mxu1 }
 0x328   : > { %v2445_v39 = vadd.f32 %v2444_v1, %v2443_v22  ;;  %v2446_v42 = vpop.f32.mrb[58].mxu1  ;;  %v1820_v14 = vpack.c.bf16 %v1810_v48, %v1809_v5 }
 0x329   : > { %v2447_v17 = vpop.f32.mrb[59].mxu1 }
 0x32a   : > { %v1785_v43 = vadd.f32 %v2445_v39, %v3439_v0  ;;  %v2448_v44 = vadd.f32 %v2447_v17, %v2446_v42  ;;  %2496 = vmatmul.mubr.bf16.gmra.mrb[72].mxu1 %v1820_v14 }
 0x32c   : > { %v1788_v45 = vadd.f32 %v2448_v44, %v3439_v0  ;;  %v1811_v46 = vmax.f32 %v1785_v43, 0.0 }
 0x32e   : > { %v1812_v47 = vmax.f32 %v1788_v45, 0.0  ;;  %v2449_v28 = vpop.f32.mrb[60].mxu1 }
 0x32f   : > { %v2450_v49 = vpop.f32.mrb[61].mxu1 }
 0x330   : > { %v2451_v50 = vadd.f32 %v2450_v49, %v2449_v28  ;;  %v2452_v27 = vpop.f32.mrb[62].mxu1  ;;  %v1821_v30 = vpack.c.bf16 %v1812_v47, %v1811_v46 }
 0x331   : > { %v2453_v52 = vpop.f32.mrb[63].mxu1 }
 0x332   : > { %v1793_v53 = vadd.f32 %v2451_v50, %v3439_v0  ;;  %v2454_v54 = vadd.f32 %v2453_v52, %v2452_v27  ;;  %2499 = vmatprep.mubr.bf16.mxu1 %v1821_v30 }
 0x334   : > { %v1796_v55 = vadd.f32 %v2454_v54, %v3439_v0  ;;  %v1813_v56 = vmax.f32 %v1793_v53, 0.0 }
 0x336   : > { %v1814_v57 = vmax.f32 %v1796_v55, 0.0 }
 0x338   : > { %v1822_v31 = vpack.c.bf16 %v1814_v57, %v1813_v56 }
 0x33a   : > { %2500 = vmatmul.mubr.bf16.gmra.mrb[76].mxu1 %v1822_v31 }
 0x3dd   : > { %v2489_v60 = vpop.f32.mrb[64].mxu1 }
 0x3de   : > { %v3464_v62 = vadd.f32 %v2489_v60, %v2380_v59  ;;  %v1928_v32 = vpop.f32.mrb[65].mxu1 }
 0x3df   : > { %v3466_v63 = vadd.f32 %v2380_v59, %v1928_v32  ;;  %v2490_v0 = vpop.f32.mrb[66].mxu1 }
 0x3e0   : > { %v3468_v3 = vadd.f32 %v2490_v0, %v2380_v59  ;;  %v1931_v4 = vpop.f32.mrb[67].mxu1  ;;  %v1996_v26 = vsel %vm1993_vm0, %v3464_v62, -1e+30 }
 0x3e1   : > { %v3473_v6 = vadd.f32 %v2380_v59, %v1931_v4  ;;  %2014 = vmax.xlane.f32.xlu1 %v1996_v26  ;;  %v1994_v7 = vsel %vm1993_vm0, %v3466_v63, -1e+30 }
 0x3e2   : > { %2010 = vmax.xlane.f32.xlu0 %v1994_v7  ;;  %v1997_v8 = vsel %vm1993_vm0, %v3468_v3, -1e+30 }
 0x3e3   : > { %v1995_v9 = vsel %vm1993_vm0, %v3473_v6, -1e+30 }
 0x3e5   : > { %2016 = vmax.xlane.f32.xlu1 %v1997_v8 }
 0x3e6   : > { %2012 = vmax.xlane.f32.xlu0 %v1995_v9 }
 0x3ed   : > { %v2493_v10 = vpop.f32.mrb[68].mxu1 }
 0x3ee   : > { %v3484_v11 = vadd.f32 %v2493_v10, %v2380_v59  ;;  %v1944_v12 = vpop.f32.mrb[69].mxu1 }
 0x3ef   : > { %v2494_v13 = vpop.f32.mrb[70].mxu1  ;;  %v3486_v15 = vadd.f32 %v2380_v59, %v1944_v12 }
 0x3f0   : > { %v3488_v16 = vadd.f32 %v2494_v13, %v2380_v59  ;;  %v1947_v18 = vpop.f32.mrb[71].mxu1  ;;  %v2000_v19 = vsel %vm1993_vm0, %v3484_v11, -1e+30 }
 0x3f1   : > { %2022 = vmax.xlane.f32.xlu0 %v2000_v19  ;;  %v3493_v20 = vadd.f32 %v2380_v59, %v1947_v18  ;;  %v3501_v23 = vsel %vm1993_vm0, %v3486_v15, -1e+30 }
 0x3f2   : > { %v2001_v21 = vsel %vm1993_vm0, %v3488_v16, -1e+30 }
 0x3f3   : > { %2024 = vmax.xlane.f32.xlu1 %v2001_v21  ;;  %v3507_v24 = vsel %vm1993_vm0, %v3493_v20, -1e+30 }
 0x3f5   : > { %2018 = vmax.xlane.f32.xlu0 %v3501_v23 }
 0x3f7   : > { %2020 = vmax.xlane.f32.xlu1 %v3507_v24 }
 0x3fd   : > { %v2497_v2 = vpop.f32.mrb[72].mxu1 }
 0x3fe   : > { %v3510_v29 = vadd.f32 %v2497_v2, %v2380_v59  ;;  %v1960_v33 = vpop.f32.mrb[73].mxu1 }
 0x3ff   : > { %v2498_v34 = vpop.f32.mrb[74].mxu1  ;;  %v3512_v35 = vadd.f32 %v2380_v59, %v1960_v33 }
 0x400   : > { %v3514_v36 = vadd.f32 %v2498_v34, %v2380_v59  ;;  %v1963_v37 = vpop.f32.mrb[75].mxu1  ;;  %v3519_v51 = vsel %vm1993_vm0, %v3510_v29, -1e+30 }
 0x401   : > { %2030 = vmax.xlane.f32.xlu0 %v3519_v51  ;;  %v3522_v25 = vadd.f32 %v2380_v59, %v1963_v37  ;;  %v3533_v38 = vsel %vm1993_vm0, %v3512_v35, -1e+30 }
 0x402   : > { %v3527_v61 = vsel %vm1993_vm0, %v3514_v36, -1e+30 }
 0x403   : > { %2032 = vmax.xlane.f32.xlu1 %v3527_v61  ;;  %v3539_v40 = vsel %vm1993_vm0, %v3522_v25, -1e+30 }
 0x405   : > { %2026 = vmax.xlane.f32.xlu0 %v3533_v38 }
 0x407   : > { %2028 = vmax.xlane.f32.xlu1 %v3539_v40 }
 0x40d   : > { %v2501_v41 = vpop.f32.mrb[76].mxu1 }
 0x40e   : > { %v1976_v5 = vpop.f32.mrb[77].mxu1  ;;  %v3544_v39 = vadd.f32 %v2501_v41, %v2380_v59 }
 0x40f   : > { %v3542_v48 = vadd.f32 %v2380_v59, %v1976_v5  ;;  %v2502_v22 = vpop.f32.mrb[78].mxu1 }
 0x410   : > { %v1979_v1 = vpop.f32.mrb[79].mxu1  ;;  %v3554_v17 = vadd.f32 %v2502_v22, %v2380_v59  ;;  %v3565_v44 = vsel %vm1993_vm0, %v3544_v39, -1e+30 }
 0x411   : > { %v3546_v42 = vadd.f32 %v2380_v59, %v1979_v1  ;;  %v3551_v14 = vsel %vm1993_vm0, %v3542_v48, -1e+30 }
 0x412   : > { %2034 = vmax.xlane.f32.xlu0 %v3551_v14  ;;  %v3571_v45 = vsel %vm1993_vm0, %v3554_v17, -1e+30 }
 0x413   : > { %v3559_v43 = vsel %vm1993_vm0, %v3546_v42, -1e+30 }
 0x414   : > { %2036 = vmax.xlane.f32.xlu1 %v3559_v43 }
 0x416   : > { %2038 = vmax.xlane.f32.xlu0 %v3565_v44 }
 0x418   : > { %2040 = vmax.xlane.f32.xlu1 %v3571_v45 }
 0x46e   : > { %v2015_v46 = vpop.xlane.xlu1 %2014 }
 0x46f   : > { %v3574_v47 = vsub.f32 %v1996_v26, %v2015_v46  ;;  %v2011_v28 = vpop.xlane.xlu0 %2010 }
 0x470   : > { %v3576_v49 = vsub.f32 %v1994_v7, %v2011_v28 }
 0x471   : > { %v2062_v50 = vmul.f32 1.442695, %v3574_v47 }
 0x472   : > { %v2058_v27 = vmul.f32 1.442695, %v3576_v49  ;;  %v2017_v30 = vpop.xlane.xlu1 %2016 }
 0x473   : > { %2744 = vpow2.f32 %v2062_v50  ;;  %v3580_v52 = vsub.f32 %v1997_v8, %v2017_v30  ;;  %v2013_v53 = vpop.xlane.xlu0 %2012 }
 0x474   : > { %v3582_v54 = vsub.f32 %v1995_v9, %v2013_v53  ;;  %2746 = vpow2.f32 %v2058_v27 }
 0x475   : > { %v2064_v55 = vmul.f32 1.442695, %v3580_v52 }
 0x476   : > { %v2060_v56 = vmul.f32 1.442695, %v3582_v54 }
 0x477   : > { %2748 = vpow2.f32 %v2064_v55 }
 0x478   : > { %2750 = vpow2.f32 %v2060_v56 }
 0x47d   : > { %v2745_v57 = vpop.eup %2744 }
 0x47e   : > { %2094 = vadd.xlane.f32.xlu0 %v2745_v57  ;;  %v2023_v31 = vpop.xlane.xlu0 %2022  ;;  %v2747_v60 = vpop.eup %2746 }
 0x47f   : > { %v3586_v59 = vsub.f32 %v2000_v19, %v2023_v31 }
 0x480   : > { %v2025_v32 = vpop.xlane.xlu1 %2024 }
 0x481   : > { %v2749_v0 = vpop.eup %2748  ;;  %v2070_v4 = vmul.f32 1.442695, %v3586_v59  ;;  %v3589_v26 = vsub.f32 %v2001_v21, %v2025_v32 }
 0x482   : > { %2096 = vadd.xlane.f32.xlu1 %v2749_v0  ;;  %2090 = vadd.xlane.f32.xlu0 %v2747_v60  ;;  %v2019_v7 = vpop.xlane.xlu0 %2018  ;;  %v2751_v12 = vpop.eup %2750 }
 0x483   : > { %2752 = vpow2.f32 %v2070_v4  ;;  %v2072_v8 = vmul.f32 1.442695, %v3589_v26  ;;  %v3593_v9 = vsub.f32 %v3501_v23, %v2019_v7 }
 0x484   : > { %v2021_v10 = vpop.xlane.xlu1 %2020 }
 0x485   : > { %2754 = vpow2.f32 %v2072_v8  ;;  %v2066_v13 = vmul.f32 1.442695, %v3593_v9  ;;  %v3597_v18 = vsub.f32 %v3507_v24, %v2021_v10 }
 0x486   : > { %2092 = vadd.xlane.f32.xlu1 %v2751_v12 }
 0x487   : > { %2756 = vpow2.f32 %v2066_v13  ;;  %v2068_v19 = vmul.f32 1.442695, %v3597_v18 }
 0x489   : > { %2758 = vpow2.f32 %v2068_v19 }
 0x48d   : > { %v2753_v21 = vpop.eup %2752 }
 0x48e   : > { %2102 = vadd.xlane.f32.xlu0 %v2753_v21  ;;  %v2031_v2 = vpop.xlane.xlu0 %2030 }
 0x48f   : > { %v2755_v33 = vpop.eup %2754  ;;  %v3601_v23 = vsub.f32 %v3519_v51, %v2031_v2 }
 0x490   : > { %v2033_v34 = vpop.xlane.xlu1 %2032  ;;  %2104 = vadd.xlane.f32.xlu1 %v2755_v33 }
 0x491   : > { %v2757_v37 = vpop.eup %2756  ;;  %v2078_v41 = vmul.f32 1.442695, %v3601_v23  ;;  %v3605_v24 = vsub.f32 %v3527_v61, %v2033_v34 }
 0x492   : > { %2098 = vadd.xlane.f32.xlu0 %v2757_v37  ;;  %v2027_v5 = vpop.xlane.xlu0 %2026 }
 0x493   : > { %v2759_v22 = vpop.eup %2758  ;;  %2760 = vpow2.f32 %v2078_v41  ;;  %v2080_v1 = vmul.f32 1.442695, %v3605_v24  ;;  %v3609_v46 = vsub.f32 %v3533_v38, %v2027_v5 }
 0x494   : > { %v2029_v28 = vpop.xlane.xlu1 %2028  ;;  %2100 = vadd.xlane.f32.xlu1 %v2759_v22 }
 0x495   : > { %2762 = vpow2.f32 %v2080_v1  ;;  %v2074_v51 = vmul.f32 1.442695, %v3609_v46  ;;  %v3613_v50 = vsub.f32 %v3539_v40, %v2029_v28 }
 0x497   : > { %2764 = vpow2.f32 %v2074_v51  ;;  %v2076_v61 = vmul.f32 1.442695, %v3613_v50 }
 0x499   : > { %2766 = vpow2.f32 %v2076_v61 }
 0x49d   : > { %v2761_v27 = vpop.eup %2760 }
 0x49e   : > { %2110 = vadd.xlane.f32.xlu0 %v2761_v27 }
 0x49f   : > { %v2763_v30 = vpop.eup %2762  ;;  %v2035_v53 = vpop.xlane.xlu0 %2034 }
 0x4a0   : > { %v3617_v55 = vsub.f32 %v3551_v14, %v2035_v53  ;;  %2112 = vadd.xlane.f32.xlu1 %v2763_v30 }
 0x4a1   : > { %v2765_v38 = vpop.eup %2764  ;;  %v2037_v56 = vpop.xlane.xlu1 %2036 }
 0x4a2   : > { %v2082_v57 = vmul.f32 1.442695, %v3617_v55  ;;  %v3621_v31 = vsub.f32 %v3559_v43, %v2037_v56  ;;  %2106 = vadd.xlane.f32.xlu0 %v2765_v38 }
 0x4a3   : > { %v2767_v40 = vpop.eup %2766  ;;  %v2039_v60 = vpop.xlane.xlu0 %2038 }
 0x4a4   : > { %2768 = vpow2.f32 %v2082_v57  ;;  %v2084_v32 = vmul.f32 1.442695, %v3621_v31  ;;  %v3625_v0 = vsub.f32 %v3565_v44, %v2039_v60  ;;  %2108 = vadd.xlane.f32.xlu1 %v2767_v40 }
 0x4a5   : > { %v2041_v14 = vpop.xlane.xlu1 %2040 }
 0x4a6   : > { %2770 = vpow2.f32 %v2084_v32  ;;  %v2086_v4 = vmul.f32 1.442695, %v3625_v0  ;;  %v3629_v7 = vsub.f32 %v3571_v45, %v2041_v14 }
 0x4a8   : > { %2772 = vpow2.f32 %v2086_v4  ;;  %v2088_v43 = vmul.f32 1.442695, %v3629_v7 }
 0x4aa   : > { %2774 = vpow2.f32 %v2088_v43 }
 0x4ae   : > { %v2769_v8 = vpop.eup %2768 }
 0x4af   : > { %2114 = vadd.xlane.f32.xlu0 %v2769_v8 }
 0x4b0   : > { %v2771_v10 = vpop.eup %2770 }
 0x4b1   : > { %2116 = vadd.xlane.f32.xlu1 %v2771_v10 }
 0x4b2   : > { %v2773_v12 = vpop.eup %2772 }
 0x4b3   : > { %2118 = vadd.xlane.f32.xlu0 %v2773_v12 }
 0x4b4   : > { %v2775_v44 = vpop.eup %2774 }
 0x4b5   : > { %2120 = vadd.xlane.f32.xlu1 %v2775_v44 }
 0x50b   : > { %v2095_v13 = vpop.xlane.xlu0 %2094 }
 0x50c   : > { %2776 = vlog2.f32 %v2095_v13 }
 0x50f   : > { %v2097_v19 = vpop.xlane.xlu1 %2096  ;;  %v2091_v21 = vpop.xlane.xlu0 %2090 }
 0x510   : > { %2778 = vlog2.f32 %v2097_v19 }
 0x511   : > { %2780 = vlog2.f32 %v2091_v21 }
 0x513   : > { %v2093_v45 = vpop.xlane.xlu1 %2092 }
 0x514   : > { %2782 = vlog2.f32 %v2093_v45 }
 0x516   : > { %v2777_v2 = vpop.eup %2776 }
 0x517   : > { %v2127_v33 = vmul.f32 0.6931472, %v2777_v2 }
 0x519   : > { %v2156_v34 = vsub.f32 %v3574_v47, %v2127_v33 }
 0x51a   : > { %v2779_v37 = vpop.eup %2778 }
 0x51b   : > { %v2781_v41 = vpop.eup %2780  ;;  %v2172_v5 = vsel %vm1993_vm0, %v2156_v34, %v3464_v62  ;;  %v2129_v22 = vmul.f32 0.6931472, %v2779_v37  ;;  %v2103_v1 = vpop.xlane.xlu0 %2102 }
 0x51c   : > { %2188 = vst [vmem:[%s3637_s10 + $0x10] sm:$0xff] %v2172_v5  ;;  %v2123_v28 = vmul.f32 0.6931472, %v2781_v41  ;;  %2784 = vlog2.f32 %v2103_v1 }
 0x51d   : > { %v2157_v51 = vsub.f32 %v3580_v52, %v2129_v22  ;;  %v2105_v61 = vpop.xlane.xlu1 %2104 }
 0x51e   : > { %v2783_v27 = vpop.eup %2782  ;;  %v2154_v47 = vsub.f32 %v3576_v49, %v2123_v28  ;;  %2786 = vlog2.f32 %v2105_v61 }
 0x51f   : > { %v2173_v30 = vsel %vm1993_vm0, %v2157_v51, %v3468_v3  ;;  %v2125_v53 = vmul.f32 0.6931472, %v2783_v27  ;;  %v2099_v62 = vpop.xlane.xlu0 %2098 }
 0x520   : > { %2189 = vst [vmem:[%s3637_s10 + $0x18] sm:$0xff] %v2173_v30  ;;  %v2170_v38 = vsel %vm1993_vm0, %v2154_v47, %v3466_v63  ;;  %2788 = vlog2.f32 %v2099_v62 }
 0x521   : > { %2186 = vst [vmem:[%s3637_s10] sm:$0xff] %v2170_v38  ;;  %v2155_v52 = vsub.f32 %v3582_v54, %v2125_v53  ;;  %v2101_v56 = vpop.xlane.xlu1 %2100 }
 0x522   : > { %2790 = vlog2.f32 %v2101_v56 }
 0x523   : > { %v2171_v49 = vsel %vm1993_vm0, %v2155_v52, %v3473_v6 }
 0x524   : > { %2187 = vst [vmem:[%s3637_s10 + $0x8] sm:$0xff] %v2171_v49 }
 0x526   : > { %v2785_v3 = vpop.eup %2784 }
 0x527   : > { %v2135_v57 = vmul.f32 0.6931472, %v2785_v3 }
 0x528   : > { %v2787_v40 = vpop.eup %2786 }
 0x529   : > { %v2160_v60 = vsub.f32 %v3586_v59, %v2135_v57  ;;  %v2137_v32 = vmul.f32 0.6931472, %v2787_v40 }
 0x52a   : > { %v2789_v63 = vpop.eup %2788 }
 0x52b   : > { %v2176_v54 = vsel %vm1993_vm0, %v2160_v60, %v3484_v11  ;;  %v2161_v14 = vsub.f32 %v3589_v26, %v2137_v32  ;;  %v2131_v4 = vmul.f32 0.6931472, %v2789_v63  ;;  %v2111_v43 = vpop.xlane.xlu0 %2110 }
 0x52c   : > { %v2791_v8 = vpop.eup %2790  ;;  %2192 = vst [vmem:[%s3637_s10 + $0x30] sm:$0xff] %v2176_v54  ;;  %2792 = vlog2.f32 %v2111_v43 }
 0x52d   : > { %v2177_v6 = vsel %vm1993_vm0, %v2161_v14, %v3488_v16  ;;  %v2158_v59 = vsub.f32 %v3593_v9, %v2131_v4  ;;  %v2133_v10 = vmul.f32 0.6931472, %v2791_v8  ;;  %v2113_v12 = vpop.xlane.xlu1 %2112 }
 0x52e   : > { %2193 = vst [vmem:[%s3637_s10 + $0x38] sm:$0xff] %v2177_v6  ;;  %2794 = vlog2.f32 %v2113_v12 }
 0x52f   : > { %v2174_v11 = vsel %vm1993_vm0, %v2158_v59, %v3486_v15  ;;  %v2159_v26 = vsub.f32 %v3597_v18, %v2133_v10  ;;  %v2107_v44 = vpop.xlane.xlu0 %2106 }
 0x530   : > { %2190 = vst [vmem:[%s3637_s10 + $0x20] sm:$0xff] %v2174_v11  ;;  %2796 = vlog2.f32 %v2107_v44 }
 0x531   : > { %v2175_v16 = vsel %vm1993_vm0, %v2159_v26, %v3493_v20  ;;  %v2109_v13 = vpop.xlane.xlu1 %2108 }
 0x532   : > { %2191 = vst [vmem:[%s3637_s10 + $0x28] sm:$0xff] %v2175_v16  ;;  %2798 = vlog2.f32 %v2109_v13 }
 0x536   : > { %v2793_v9 = vpop.eup %2792 }
 0x537   : > { %v2143_v19 = vmul.f32 0.6931472, %v2793_v9 }
 0x538   : > { %v2795_v21 = vpop.eup %2794 }
 0x539   : > { %v2164_v45 = vsub.f32 %v3601_v23, %v2143_v19  ;;  %v2145_v15 = vmul.f32 0.6931472, %v2795_v21 }
 0x53a   : > { %v2797_v2 = vpop.eup %2796 }
 0x53b   : > { %v2180_v18 = vsel %vm1993_vm0, %v2164_v45, %v3510_v29  ;;  %v2165_v33 = vsub.f32 %v3605_v24, %v2145_v15  ;;  %v2139_v34 = vmul.f32 0.6931472, %v2797_v2 }
 0x53c   : > { %v2799_v20 = vpop.eup %2798  ;;  %2196 = vst [vmem:[%s3637_s10 + $0x50] sm:$0xff] %v2180_v18  ;;  %v2115_v37 = vpop.xlane.xlu0 %2114 }
 0x53d   : > { %v2181_v41 = vsel %vm1993_vm0, %v2165_v33, %v3514_v36  ;;  %v2162_v23 = vsub.f32 %v3609_v46, %v2139_v34  ;;  %v2141_v5 = vmul.f32 0.6931472, %v2799_v20  ;;  %2800 = vlog2.f32 %v2115_v37 }
 0x53e   : > { %2197 = vst [vmem:[%s3637_s10 + $0x58] sm:$0xff] %v2181_v41  ;;  %v2117_v22 = vpop.xlane.xlu1 %2116 }
 0x53f   : > { %v2178_v29 = vsel %vm1993_vm0, %v2162_v23, %v3512_v35  ;;  %v2163_v24 = vsub.f32 %v3613_v50, %v2141_v5  ;;  %2802 = vlog2.f32 %v2117_v22 }
 0x540   : > { %2194 = vst [vmem:[%s3637_s10 + $0x40] sm:$0xff] %v2178_v29  ;;  %v2119_v1 = vpop.xlane.xlu0 %2118 }
 0x541   : > { %v2179_v36 = vsel %vm1993_vm0, %v2163_v24, %v3522_v25  ;;  %2804 = vlog2.f32 %v2119_v1 }
 0x542   : > { %2195 = vst [vmem:[%s3637_s10 + $0x48] sm:$0xff] %v2179_v36  ;;  %v2121_v46 = vpop.xlane.xlu1 %2120 }
 0x543   : > { %2806 = vlog2.f32 %v2121_v46 }
 0x547   : > { %v2801_v28 = vpop.eup %2800 }
 0x548   : > { %v2147_v51 = vmul.f32 0.6931472, %v2801_v28 }
 0x549   : > { %v2803_v61 = vpop.eup %2802 }
 0x54a   : > { %v2166_v35 = vsub.f32 %v3617_v55, %v2147_v51  ;;  %v2149_v50 = vmul.f32 0.6931472, %v2803_v61 }
 0x54b   : > { %v2805_v27 = vpop.eup %2804 }
 0x54c   : > { %v2182_v47 = vsel %vm1993_vm0, %v2166_v35, %v3542_v48  ;;  %v2167_v25 = vsub.f32 %v3621_v31, %v2149_v50  ;;  %v2151_v30 = vmul.f32 0.6931472, %v2805_v27 }
 0x54d   : > { %v2807_v53 = vpop.eup %2806  ;;  %2198 = vst [vmem:[%s3637_s10 + $0x60] sm:$0xff] %v2182_v47 }
 0x54e   : > { %v2183_v62 = vsel %vm1993_vm0, %v2167_v25, %v3546_v42  ;;  %v2168_v38 = vsub.f32 %v3625_v0, %v2151_v30  ;;  %v2153_v52 = vmul.f32 0.6931472, %v2807_v53 }
 0x54f   : > { %2199 = vst [vmem:[%s3637_s10 + $0x68] sm:$0xff] %v2183_v62 }
 0x550   : > { %v2184_v55 = vsel %vm1993_vm0, %v2168_v38, %v3544_v39  ;;  %v2169_v56 = vsub.f32 %v3629_v7, %v2153_v52 }
 0x551   : > { %2200 = vst [vmem:[%s3637_s10 + $0x70] sm:$0xff] %v2184_v55 }
 0x552   : > { %v2185_v48 = vsel %vm1993_vm0, %v2169_v56, %v3554_v17 }
 0x553   : > { %2201 = vst [vmem:[%s3637_s10 + $0x78] sm:$0xff] %v2185_v48 }
 0x554 PF: > { %s19_s30 = sadd.s32 1, %s2814_s30  }
 0x555   : > { %p16_p4 = scmp.ge.s32.totalorder %s19_s30, 4  }
 0x557   :  { %18 = sbr.rel (!%p16_p4) target bundleno = 1 (0x1), region = 86 }

</bundles_post_ra>
